<compile_context>
chip_gen: v7x
topology: tpu7x:2x2x1
jax: 0.10.0
libtpu: 0.0.40
codegen_flags: <defaults>
</compile_context>

<pallas_src>
import numpy as np

import jax
import jax.numpy as jnp
from jax.experimental import pallas as pl
from jax.experimental.pallas import tpu as pltpu


# ---------------------------------------------------------------------------
# Fused forward kernel (one grid step = BT batch elements)
# ---------------------------------------------------------------------------
def _simplenet_kernel(x_ref, w1_ref, b1_ref, w2_ref, b2_ref,
                      wfc1_ref, bfc1_ref, wfc2_ref, bfc2_ref,
                      wout_ref, bout_ref, out_ref):
    f32, bf16 = jnp.float32, jnp.bfloat16
    BT = x_ref.shape[0]

    # ---- conv1 (1 -> 6, k=5) + bias + relu as a lane-packed MXU matmul.
    # X1[b, i, di*28 + k] = x[b, i+di, k]   -> (BT, 24, 140)
    x1 = jnp.concatenate([x_ref[:, di:di + 24, :] for di in range(5)], axis=-1)
    x1 = x1.astype(bf16)
    w1 = w1_ref[...]                                           # (140, 144) bf16
    y1 = jnp.stack([jnp.dot(x1[b], w1, preferred_element_type=f32)
                    for b in range(BT)], axis=0)               # (BT, 24, 144) f32
    y1 = jnp.maximum(y1 + b1_ref[...], 0.0)
    # output lanes packed as (j % 2) * 72 + c * 12 + j // 2  (even-j | odd-j)

    # ---- max_pool 2x2: lane-half max (over j) + sublane pair max (over i).
    m1 = jnp.maximum(y1[:, :, :72], y1[:, :, 72:])             # (BT, 24, 72)
    p1 = jnp.stack([jnp.maximum(m1[:, 2 * r, :], m1[:, 2 * r + 1, :])
                    for r in range(12)], axis=1)               # (BT, 12, 72)
    # p1 lanes: ci * 12 + j'   (pooled 12x12 map, 6 channels)

    # ---- conv2 (6 -> 12, k=5) + bias + relu as a lane-packed MXU matmul.
    # X2[b, r, di*72 + ci*12 + m] = p1[b, r+di, ci*12 + m]  -> (BT, 8, 360)
    x2 = jnp.concatenate([p1[:, di:di + 8, :] for di in range(5)], axis=-1)
    x2 = x2.astype(bf16)
    w2 = w2_ref[...]                                           # (360, 96) bf16
    y2 = jnp.stack([jnp.dot(x2[b], w2, preferred_element_type=f32)
                    for b in range(BT)], axis=0)               # (BT, 8, 96) f32
    y2 = jnp.maximum(y2 + b2_ref[...], 0.0)
    # output lanes packed as (s % 2) * 48 + co * 4 + s // 2

    # ---- max_pool 2x2 -> (BT, 4, 48); lanes co * 4 + s'
    m2 = jnp.maximum(y2[:, :, :48], y2[:, :, 48:])             # (BT, 8, 48)
    p2 = jnp.stack([jnp.maximum(m2[:, 2 * r, :], m2[:, 2 * r + 1, :])
                    for r in range(4)], axis=1)                # (BT, 4, 48)

    # ---- flatten: 4 lane concats; feature order g = rc*48 + co*4 + sc.
    # fc1 weight rows were permuted offline to compensate for this order.
    feats = jnp.concatenate([p2[:, r, :] for r in range(4)], axis=-1)  # (BT,192)

    # ---- fc1 + relu, fc2 + relu, out: batched (M=BT) bf16 MXU matmuls.
    h = jnp.dot(feats.astype(bf16), wfc1_ref[...], preferred_element_type=f32)
    h = jnp.maximum(h + bfc1_ref[...], 0.0)
    h = jnp.dot(h.astype(bf16), wfc2_ref[...], preferred_element_type=f32)
    h = jnp.maximum(h + bfc2_ref[...], 0.0)
    logits = jnp.dot(h.astype(bf16), wout_ref[...], preferred_element_type=f32)
    out_ref[...] = logits + bout_ref[...]                      # (BT, 128) lane-dense


# ---------------------------------------------------------------------------
# One-time weight repack (outside jit): conv kernels -> banded matmul weights
# with pooling-friendly column packing; FC weights transposed / row-permuted /
# zero-padded to lane-dense 128 columns; matmul weights stored as bf16.
# ---------------------------------------------------------------------------
def pack_params(params):
    w1 = np.asarray(params["conv1_w"], np.float32)     # (6, 1, 5, 5)
    b1 = np.asarray(params["conv1_b"], np.float32)     # (6,)
    w2 = np.asarray(params["conv2_w"], np.float32)     # (12, 6, 5, 5)
    b2 = np.asarray(params["conv2_b"], np.float32)     # (12,)
    fc1_w = np.asarray(params["fc1_w"], np.float32)    # (120, 192)
    fc1_b = np.asarray(params["fc1_b"], np.float32)
    fc2_w = np.asarray(params["fc2_w"], np.float32)    # (60, 120)
    fc2_b = np.asarray(params["fc2_b"], np.float32)
    out_w = np.asarray(params["out_w"], np.float32)    # (10, 60)
    out_b = np.asarray(params["out_b"], np.float32)

    # conv1 banded weight: row = di*28 + input_col, col = (j%2)*72 + c*12 + j//2
    W1 = np.zeros((140, 144), np.float32)
    for c in range(6):
        for di in range(5):
            for dj in range(5):
                for j in range(24):
                    col = (j % 2) * 72 + c * 12 + (j // 2)
                    W1[di * 28 + j + dj, col] = w1[c, 0, di, dj]
    B1 = np.tile(np.repeat(b1, 12), 2)[None, :]        # (1, 144)

    # conv2 banded weight: row = di*72 + ci*12 + m, col = (s%2)*48 + co*4 + s//2
    W2 = np.zeros((360, 96), np.float32)
    for co in range(12):
        for ci in range(6):
            for di in range(5):
                for dj in range(5):
                    for s in range(8):
                        col = (s % 2) * 48 + co * 4 + (s // 2)
                        W2[di * 72 + ci * 12 + s + dj, col] = w2[co, ci, di, dj]
    B2 = np.tile(np.repeat(b2, 4), 2)[None, :]         # (1, 96)

    # fc1: rows permuted so kernel-order features g = rc*48 + co*4 + sc hit the
    # PyTorch-order feature f = co*16 + rc*4 + sc. Columns zero-padded to 128.
    Wfc1 = np.zeros((192, 128), np.float32)
    for g in range(192):
        rc, rem = divmod(g, 48)
        co, sc = divmod(rem, 4)
        f = co * 16 + rc * 4 + sc
        Wfc1[g, :120] = fc1_w[:, f]
    bfc1 = np.zeros((1, 128), np.float32); bfc1[0, :120] = fc1_b

    Wfc2 = np.zeros((128, 128), np.float32); Wfc2[:120, :60] = fc2_w.T
    bfc2 = np.zeros((1, 128), np.float32);   bfc2[0, :60] = fc2_b
    Wout = np.zeros((128, 128), np.float32); Wout[:60, :10] = out_w.T
    bout = np.zeros((1, 128), np.float32);   bout[0, :10] = out_b

    bf = jnp.bfloat16
    f32 = jnp.float32
    return {
        "w1": jnp.asarray(W1, bf),   "b1": jnp.asarray(B1, f32),
        "w2": jnp.asarray(W2, bf),   "b2": jnp.asarray(B2, f32),
        "wfc1": jnp.asarray(Wfc1, bf), "bfc1": jnp.asarray(bfc1, f32),
        "wfc2": jnp.asarray(Wfc2, bf), "bfc2": jnp.asarray(bfc2, f32),
        "wout": jnp.asarray(Wout, bf), "bout": jnp.asarray(bout, f32),
    }


def simplenet_forward(x_nchw, packed, block_batch=8):
    B = x_nchw.shape[0]
    BT = min(block_batch, B)                      # images per grid step
    Bp = pl.cdiv(B, BT) * BT
    x = x_nchw[:, 0, :, :]                        # (B, 28, 28); in_channels == 1
    if Bp != B:
        x = jnp.pad(x, ((0, Bp - B), (0, 0), (0, 0)))

    def full(arr):                                # resident, whole-array block
        return pl.BlockSpec(arr.shape, lambda b, _nd=arr.ndim: (0,) * _nd)

    out = pl.pallas_call(
        _simplenet_kernel,
        grid=(Bp // BT,),
        out_shape=jax.ShapeDtypeStruct((Bp, 128), jnp.float32),
        in_specs=[
            pl.BlockSpec((BT, 28, 28), lambda b: (b, 0, 0)),   # BT images / step
            full(packed["w1"]), full(packed["b1"]),
            full(packed["w2"]), full(packed["b2"]),
            full(packed["wfc1"]), full(packed["bfc1"]),
            full(packed["wfc2"]), full(packed["bfc2"]),
            full(packed["wout"]), full(packed["bout"]),
        ],
        out_specs=pl.BlockSpec((BT, 128), lambda b: (b, 0)),
        compiler_params=pltpu.CompilerParams(
            dimension_semantics=("parallel",)),
    )(x, packed["w1"], packed["b1"], packed["w2"], packed["b2"],
      packed["wfc1"], packed["bfc1"], packed["wfc2"], packed["bfc2"],
      packed["wout"], packed["bout"])
    return out[:B, :10]


def init_params(key):
    ks = jax.random.split(key, 10)

    def u(k, shape, fan_in):
        bound = 1.0 / jnp.sqrt(jnp.float32(fan_in))
        return jax.random.uniform(k, shape, jnp.float32, -bound, bound)

    return {
        "conv1_w": u(ks[0], (6, 1, 5, 5), 1 * 5 * 5),
        "conv1_b": u(ks[1], (6,), 1 * 5 * 5),
        "conv2_w": u(ks[2], (12, 6, 5, 5), 6 * 5 * 5),
        "conv2_b": u(ks[3], (12,), 6 * 5 * 5),
        "fc1_w": u(ks[4], (120, 192), 192),
        "fc1_b": u(ks[5], (120,), 192),
        "fc2_w": u(ks[6], (60, 120), 120),
        "fc2_b": u(ks[7], (60,), 120),
        "out_w": u(ks[8], (10, 60), 60),
        "out_b": u(ks[9], (10,), 60),
    }


if __name__ == "__main__":
    key = jax.random.PRNGKey(0)
    pkey, xkey = jax.random.split(key)
    params = init_params(pkey)
    packed = pack_params(params)       # one-time repack, outside jit / hot path
    # Module implies 28x28 single-channel inputs (28 -> 24 -> 12 -> 8 -> 4).
    x = jax.random.normal(xkey, (2, 1, 28, 28), dtype=jnp.float32)

    fwd = jax.jit(simplenet_forward)
    out = jax.block_until_ready(fwd(x, packed))
    assert out.shape == (2, 10), out.shape
    assert out.dtype == jnp.float32
    print("KERNEL_OK")
</pallas_src>

<mosaic_0001>
module attributes {stable_mosaic.version = 11 : i64} {
  func.func @_simplenet_kernel(%arg0: i32, %arg1: memref<2x28x28xf32, #tpu.memory_space<vmem>>, %arg2: memref<140x144xbf16, #tpu.memory_space<vmem>>, %arg3: memref<1x144xf32, #tpu.memory_space<vmem>>, %arg4: memref<360x96xbf16, #tpu.memory_space<vmem>>, %arg5: memref<1x96xf32, #tpu.memory_space<vmem>>, %arg6: memref<192x128xbf16, #tpu.memory_space<vmem>>, %arg7: memref<1x128xf32, #tpu.memory_space<vmem>>, %arg8: memref<128x128xbf16, #tpu.memory_space<vmem>>, %arg9: memref<1x128xf32, #tpu.memory_space<vmem>>, %arg10: memref<128x128xbf16, #tpu.memory_space<vmem>>, %arg11: memref<1x128xf32, #tpu.memory_space<vmem>>, %arg12: memref<2x128xf32, #tpu.memory_space<vmem>>) attributes {dimension_semantics = [#tpu.dimension_semantics<parallel>], iteration_bounds = array<i64: 1>, scalar_prefetch = 0 : i64, scratch_operands = 0 : i64, tpu.core_type = #tpu.core_type<tc>, window_params = [{transform_indices = @transform_0, window_bounds = array<i64: 2, 28, 28>}, {pipeline_mode = #tpu.pipeline_mode<synchronous>, transform_indices = @transform_1, window_bounds = array<i64: 140, 144>}, {pipeline_mode = #tpu.pipeline_mode<synchronous>, transform_indices = @transform_2, window_bounds = array<i64: 1, 144>}, {pipeline_mode = #tpu.pipeline_mode<synchronous>, transform_indices = @transform_3, window_bounds = array<i64: 360, 96>}, {pipeline_mode = #tpu.pipeline_mode<synchronous>, transform_indices = @transform_4, window_bounds = array<i64: 1, 96>}, {pipeline_mode = #tpu.pipeline_mode<synchronous>, transform_indices = @transform_5, window_bounds = array<i64: 192, 128>}, {pipeline_mode = #tpu.pipeline_mode<synchronous>, transform_indices = @transform_6, window_bounds = array<i64: 1, 128>}, {pipeline_mode = #tpu.pipeline_mode<synchronous>, transform_indices = @transform_7, window_bounds = array<i64: 128, 128>}, {pipeline_mode = #tpu.pipeline_mode<synchronous>, transform_indices = @transform_8, window_bounds = array<i64: 1, 128>}, {pipeline_mode = #tpu.pipeline_mode<synchronous>, transform_indices = @transform_9, window_bounds = array<i64: 128, 128>}, {pipeline_mode = #tpu.pipeline_mode<synchronous>, transform_indices = @transform_10, window_bounds = array<i64: 1, 128>}, {transform_indices = @transform_11, window_bounds = array<i64: 2, 128>}]} {
    %c0 = arith.constant 0 : index
    %c0_0 = arith.constant 0 : index
    %c0_1 = arith.constant 0 : index
    %0 = vector.load %arg1[%c0, %c0_0, %c0_1] : memref<2x28x28xf32, #tpu.memory_space<vmem>>, vector<2x24x28xf32>
    %c0_2 = arith.constant 0 : index
    %c1 = arith.constant 1 : index
    %c0_3 = arith.constant 0 : index
    %1 = vector.load %arg1[%c0_2, %c1, %c0_3] : memref<2x28x28xf32, #tpu.memory_space<vmem>>, vector<2x24x28xf32>
    %c0_4 = arith.constant 0 : index
    %c2 = arith.constant 2 : index
    %c0_5 = arith.constant 0 : index
    %2 = vector.load %arg1[%c0_4, %c2, %c0_5] : memref<2x28x28xf32, #tpu.memory_space<vmem>>, vector<2x24x28xf32>
    %c0_6 = arith.constant 0 : index
    %c3 = arith.constant 3 : index
    %c0_7 = arith.constant 0 : index
    %3 = vector.load %arg1[%c0_6, %c3, %c0_7] : memref<2x28x28xf32, #tpu.memory_space<vmem>>, vector<2x24x28xf32>
    %c0_8 = arith.constant 0 : index
    %c4 = arith.constant 4 : index
    %c0_9 = arith.constant 0 : index
    %4 = vector.load %arg1[%c0_8, %c4, %c0_9] : memref<2x28x28xf32, #tpu.memory_space<vmem>>, vector<2x24x28xf32>
    %5 = tpu.concatenate %0, %1, %2, %3, %4 in 2 : vector<2x24x28xf32>, vector<2x24x28xf32>, vector<2x24x28xf32>, vector<2x24x28xf32>, vector<2x24x28xf32> -> vector<2x24x140xf32>
    %6 = arith.truncf %5 : vector<2x24x140xf32> to vector<2x24x140xbf16>
    %c0_10 = arith.constant 0 : index
    %c0_11 = arith.constant 0 : index
    %7 = vector.load %arg2[%c0_10, %c0_11] : memref<140x144xbf16, #tpu.memory_space<vmem>>, vector<140x144xbf16>
    %8 = vector.extract_strided_slice %6 {offsets = [0, 0, 0], sizes = [1, 24, 140], strides = [1, 1, 1]} : vector<2x24x140xbf16> to vector<1x24x140xbf16>
    %9 = vector.shape_cast %8 : vector<1x24x140xbf16> to vector<24x140xbf16>
    %cst = arith.constant dense<0.000000e+00> : vector<24x144xf32>
    %10 = tpu.matmul %9, %7, %cst {dimension_numbers = #tpu.dot_dimension_numbers<[1], [0], [0], [1], [0, 0, 1, 1], [], []>} : vector<24x140xbf16>, vector<140x144xbf16>, vector<24x144xf32> -> vector<24x144xf32>
    %11 = vector.extract_strided_slice %6 {offsets = [1, 0, 0], sizes = [1, 24, 140], strides = [1, 1, 1]} : vector<2x24x140xbf16> to vector<1x24x140xbf16>
    %12 = vector.shape_cast %11 : vector<1x24x140xbf16> to vector<24x140xbf16>
    %cst_12 = arith.constant dense<0.000000e+00> : vector<24x144xf32>
    %13 = tpu.matmul %12, %7, %cst_12 {dimension_numbers = #tpu.dot_dimension_numbers<[1], [0], [0], [1], [0, 0, 1, 1], [], []>} : vector<24x140xbf16>, vector<140x144xbf16>, vector<24x144xf32> -> vector<24x144xf32>
    %14 = vector.shape_cast %10 : vector<24x144xf32> to vector<1x24x144xf32>
    %15 = vector.shape_cast %13 : vector<24x144xf32> to vector<1x24x144xf32>
    %16 = tpu.concatenate %14, %15 in 0 : vector<1x24x144xf32>, vector<1x24x144xf32> -> vector<2x24x144xf32>
    %c0_13 = arith.constant 0 : index
    %c0_14 = arith.constant 0 : index
    %17 = vector.load %arg3[%c0_13, %c0_14] : memref<1x144xf32, #tpu.memory_space<vmem>>, vector<1x144xf32>
    %18 = vector.shape_cast %17 : vector<1x144xf32> to vector<1x1x144xf32>
    %19 = vector.broadcast %18 : vector<1x1x144xf32> to vector<2x24x144xf32>
    %20 = arith.addf %16, %19 : vector<2x24x144xf32>
    %cst_15 = arith.constant 0.000000e+00 : f32
    %21 = vector.broadcast %cst_15 : f32 to vector<2x24x144xf32>
    %22 = arith.maximumf %20, %21 : vector<2x24x144xf32>
    %23 = vector.extract_strided_slice %22 {offsets = [0, 0, 0], sizes = [2, 24, 72], strides = [1, 1, 1]} : vector<2x24x144xf32> to vector<2x24x72xf32>
    %24 = vector.extract_strided_slice %22 {offsets = [0, 0, 72], sizes = [2, 24, 72], strides = [1, 1, 1]} : vector<2x24x144xf32> to vector<2x24x72xf32>
    %25 = arith.maximumf %23, %24 : vector<2x24x72xf32>
    %26 = vector.extract_strided_slice %25 {offsets = [0, 0, 0], sizes = [2, 1, 72], strides = [1, 1, 1]} : vector<2x24x72xf32> to vector<2x1x72xf32>
    %27 = vector.shape_cast %26 : vector<2x1x72xf32> to vector<2x72xf32>
    %28 = vector.extract_strided_slice %25 {offsets = [0, 1, 0], sizes = [2, 1, 72], strides = [1, 1, 1]} : vector<2x24x72xf32> to vector<2x1x72xf32>
    %29 = vector.shape_cast %28 : vector<2x1x72xf32> to vector<2x72xf32>
    %30 = arith.maximumf %27, %29 : vector<2x72xf32>
    %31 = vector.extract_strided_slice %25 {offsets = [0, 2, 0], sizes = [2, 1, 72], strides = [1, 1, 1]} : vector<2x24x72xf32> to vector<2x1x72xf32>
    %32 = vector.shape_cast %31 : vector<2x1x72xf32> to vector<2x72xf32>
    %33 = vector.extract_strided_slice %25 {offsets = [0, 3, 0], sizes = [2, 1, 72], strides = [1, 1, 1]} : vector<2x24x72xf32> to vector<2x1x72xf32>
    %34 = vector.shape_cast %33 : vector<2x1x72xf32> to vector<2x72xf32>
    %35 = arith.maximumf %32, %34 : vector<2x72xf32>
    %36 = vector.extract_strided_slice %25 {offsets = [0, 4, 0], sizes = [2, 1, 72], strides = [1, 1, 1]} : vector<2x24x72xf32> to vector<2x1x72xf32>
    %37 = vector.shape_cast %36 : vector<2x1x72xf32> to vector<2x72xf32>
    %38 = vector.extract_strided_slice %25 {offsets = [0, 5, 0], sizes = [2, 1, 72], strides = [1, 1, 1]} : vector<2x24x72xf32> to vector<2x1x72xf32>
    %39 = vector.shape_cast %38 : vector<2x1x72xf32> to vector<2x72xf32>
    %40 = arith.maximumf %37, %39 : vector<2x72xf32>
    %41 = vector.extract_strided_slice %25 {offsets = [0, 6, 0], sizes = [2, 1, 72], strides = [1, 1, 1]} : vector<2x24x72xf32> to vector<2x1x72xf32>
    %42 = vector.shape_cast %41 : vector<2x1x72xf32> to vector<2x72xf32>
    %43 = vector.extract_strided_slice %25 {offsets = [0, 7, 0], sizes = [2, 1, 72], strides = [1, 1, 1]} : vector<2x24x72xf32> to vector<2x1x72xf32>
    %44 = vector.shape_cast %43 : vector<2x1x72xf32> to vector<2x72xf32>
    %45 = arith.maximumf %42, %44 : vector<2x72xf32>
    %46 = vector.extract_strided_slice %25 {offsets = [0, 8, 0], sizes = [2, 1, 72], strides = [1, 1, 1]} : vector<2x24x72xf32> to vector<2x1x72xf32>
    %47 = vector.shape_cast %46 : vector<2x1x72xf32> to vector<2x72xf32>
    %48 = vector.extract_strided_slice %25 {offsets = [0, 9, 0], sizes = [2, 1, 72], strides = [1, 1, 1]} : vector<2x24x72xf32> to vector<2x1x72xf32>
    %49 = vector.shape_cast %48 : vector<2x1x72xf32> to vector<2x72xf32>
    %50 = arith.maximumf %47, %49 : vector<2x72xf32>
    %51 = vector.extract_strided_slice %25 {offsets = [0, 10, 0], sizes = [2, 1, 72], strides = [1, 1, 1]} : vector<2x24x72xf32> to vector<2x1x72xf32>
    %52 = vector.shape_cast %51 : vector<2x1x72xf32> to vector<2x72xf32>
    %53 = vector.extract_strided_slice %25 {offsets = [0, 11, 0], sizes = [2, 1, 72], strides = [1, 1, 1]} : vector<2x24x72xf32> to vector<2x1x72xf32>
    %54 = vector.shape_cast %53 : vector<2x1x72xf32> to vector<2x72xf32>
    %55 = arith.maximumf %52, %54 : vector<2x72xf32>
    %56 = vector.extract_strided_slice %25 {offsets = [0, 12, 0], sizes = [2, 1, 72], strides = [1, 1, 1]} : vector<2x24x72xf32> to vector<2x1x72xf32>
    %57 = vector.shape_cast %56 : vector<2x1x72xf32> to vector<2x72xf32>
    %58 = vector.extract_strided_slice %25 {offsets = [0, 13, 0], sizes = [2, 1, 72], strides = [1, 1, 1]} : vector<2x24x72xf32> to vector<2x1x72xf32>
    %59 = vector.shape_cast %58 : vector<2x1x72xf32> to vector<2x72xf32>
    %60 = arith.maximumf %57, %59 : vector<2x72xf32>
    %61 = vector.extract_strided_slice %25 {offsets = [0, 14, 0], sizes = [2, 1, 72], strides = [1, 1, 1]} : vector<2x24x72xf32> to vector<2x1x72xf32>
    %62 = vector.shape_cast %61 : vector<2x1x72xf32> to vector<2x72xf32>
    %63 = vector.extract_strided_slice %25 {offsets = [0, 15, 0], sizes = [2, 1, 72], strides = [1, 1, 1]} : vector<2x24x72xf32> to vector<2x1x72xf32>
    %64 = vector.shape_cast %63 : vector<2x1x72xf32> to vector<2x72xf32>
    %65 = arith.maximumf %62, %64 : vector<2x72xf32>
    %66 = vector.extract_strided_slice %25 {offsets = [0, 16, 0], sizes = [2, 1, 72], strides = [1, 1, 1]} : vector<2x24x72xf32> to vector<2x1x72xf32>
    %67 = vector.shape_cast %66 : vector<2x1x72xf32> to vector<2x72xf32>
    %68 = vector.extract_strided_slice %25 {offsets = [0, 17, 0], sizes = [2, 1, 72], strides = [1, 1, 1]} : vector<2x24x72xf32> to vector<2x1x72xf32>
    %69 = vector.shape_cast %68 : vector<2x1x72xf32> to vector<2x72xf32>
    %70 = arith.maximumf %67, %69 : vector<2x72xf32>
    %71 = vector.extract_strided_slice %25 {offsets = [0, 18, 0], sizes = [2, 1, 72], strides = [1, 1, 1]} : vector<2x24x72xf32> to vector<2x1x72xf32>
    %72 = vector.shape_cast %71 : vector<2x1x72xf32> to vector<2x72xf32>
    %73 = vector.extract_strided_slice %25 {offsets = [0, 19, 0], sizes = [2, 1, 72], strides = [1, 1, 1]} : vector<2x24x72xf32> to vector<2x1x72xf32>
    %74 = vector.shape_cast %73 : vector<2x1x72xf32> to vector<2x72xf32>
    %75 = arith.maximumf %72, %74 : vector<2x72xf32>
    %76 = vector.extract_strided_slice %25 {offsets = [0, 20, 0], sizes = [2, 1, 72], strides = [1, 1, 1]} : vector<2x24x72xf32> to vector<2x1x72xf32>
    %77 = vector.shape_cast %76 : vector<2x1x72xf32> to vector<2x72xf32>
    %78 = vector.extract_strided_slice %25 {offsets = [0, 21, 0], sizes = [2, 1, 72], strides = [1, 1, 1]} : vector<2x24x72xf32> to vector<2x1x72xf32>
    %79 = vector.shape_cast %78 : vector<2x1x72xf32> to vector<2x72xf32>
    %80 = arith.maximumf %77, %79 : vector<2x72xf32>
    %81 = vector.extract_strided_slice %25 {offsets = [0, 22, 0], sizes = [2, 1, 72], strides = [1, 1, 1]} : vector<2x24x72xf32> to vector<2x1x72xf32>
    %82 = vector.shape_cast %81 : vector<2x1x72xf32> to vector<2x72xf32>
    %83 = vector.extract_strided_slice %25 {offsets = [0, 23, 0], sizes = [2, 1, 72], strides = [1, 1, 1]} : vector<2x24x72xf32> to vector<2x1x72xf32>
    %84 = vector.shape_cast %83 : vector<2x1x72xf32> to vector<2x72xf32>
    %85 = arith.maximumf %82, %84 : vector<2x72xf32>
    %86 = vector.shape_cast %30 : vector<2x72xf32> to vector<2x1x72xf32>
    %87 = vector.shape_cast %35 : vector<2x72xf32> to vector<2x1x72xf32>
    %88 = vector.shape_cast %40 : vector<2x72xf32> to vector<2x1x72xf32>
    %89 = vector.shape_cast %45 : vector<2x72xf32> to vector<2x1x72xf32>
    %90 = vector.shape_cast %50 : vector<2x72xf32> to vector<2x1x72xf32>
    %91 = vector.shape_cast %55 : vector<2x72xf32> to vector<2x1x72xf32>
    %92 = vector.shape_cast %60 : vector<2x72xf32> to vector<2x1x72xf32>
    %93 = vector.shape_cast %65 : vector<2x72xf32> to vector<2x1x72xf32>
    %94 = vector.shape_cast %70 : vector<2x72xf32> to vector<2x1x72xf32>
    %95 = vector.shape_cast %75 : vector<2x72xf32> to vector<2x1x72xf32>
    %96 = vector.shape_cast %80 : vector<2x72xf32> to vector<2x1x72xf32>
    %97 = vector.shape_cast %85 : vector<2x72xf32> to vector<2x1x72xf32>
    %98 = tpu.concatenate %86, %87, %88, %89, %90, %91, %92, %93, %94, %95, %96, %97 in 1 : vector<2x1x72xf32>, vector<2x1x72xf32>, vector<2x1x72xf32>, vector<2x1x72xf32>, vector<2x1x72xf32>, vector<2x1x72xf32>, vector<2x1x72xf32>, vector<2x1x72xf32>, vector<2x1x72xf32>, vector<2x1x72xf32>, vector<2x1x72xf32>, vector<2x1x72xf32> -> vector<2x12x72xf32>
    %99 = vector.extract_strided_slice %98 {offsets = [0, 0, 0], sizes = [2, 8, 72], strides = [1, 1, 1]} : vector<2x12x72xf32> to vector<2x8x72xf32>
    %100 = vector.extract_strided_slice %98 {offsets = [0, 1, 0], sizes = [2, 8, 72], strides = [1, 1, 1]} : vector<2x12x72xf32> to vector<2x8x72xf32>
    %101 = vector.extract_strided_slice %98 {offsets = [0, 2, 0], sizes = [2, 8, 72], strides = [1, 1, 1]} : vector<2x12x72xf32> to vector<2x8x72xf32>
    %102 = vector.extract_strided_slice %98 {offsets = [0, 3, 0], sizes = [2, 8, 72], strides = [1, 1, 1]} : vector<2x12x72xf32> to vector<2x8x72xf32>
    %103 = vector.extract_strided_slice %98 {offsets = [0, 4, 0], sizes = [2, 8, 72], strides = [1, 1, 1]} : vector<2x12x72xf32> to vector<2x8x72xf32>
    %104 = tpu.concatenate %99, %100, %101, %102, %103 in 2 : vector<2x8x72xf32>, vector<2x8x72xf32>, vector<2x8x72xf32>, vector<2x8x72xf32>, vector<2x8x72xf32> -> vector<2x8x360xf32>
    %105 = arith.truncf %104 : vector<2x8x360xf32> to vector<2x8x360xbf16>
    %c0_16 = arith.constant 0 : index
    %c0_17 = arith.constant 0 : index
    %106 = vector.load %arg4[%c0_16, %c0_17] : memref<360x96xbf16, #tpu.memory_space<vmem>>, vector<360x96xbf16>
    %107 = vector.extract_strided_slice %105 {offsets = [0, 0, 0], sizes = [1, 8, 360], strides = [1, 1, 1]} : vector<2x8x360xbf16> to vector<1x8x360xbf16>
    %108 = vector.shape_cast %107 : vector<1x8x360xbf16> to vector<8x360xbf16>
    %cst_18 = arith.constant dense<0.000000e+00> : vector<8x96xf32>
    %109 = tpu.matmul %108, %106, %cst_18 {dimension_numbers = #tpu.dot_dimension_numbers<[1], [0], [0], [1], [0, 0, 1, 1], [], []>} : vector<8x360xbf16>, vector<360x96xbf16>, vector<8x96xf32> -> vector<8x96xf32>
    %110 = vector.extract_strided_slice %105 {offsets = [1, 0, 0], sizes = [1, 8, 360], strides = [1, 1, 1]} : vector<2x8x360xbf16> to vector<1x8x360xbf16>
    %111 = vector.shape_cast %110 : vector<1x8x360xbf16> to vector<8x360xbf16>
    %cst_19 = arith.constant dense<0.000000e+00> : vector<8x96xf32>
    %112 = tpu.matmul %111, %106, %cst_19 {dimension_numbers = #tpu.dot_dimension_numbers<[1], [0], [0], [1], [0, 0, 1, 1], [], []>} : vector<8x360xbf16>, vector<360x96xbf16>, vector<8x96xf32> -> vector<8x96xf32>
    %113 = vector.shape_cast %109 : vector<8x96xf32> to vector<1x8x96xf32>
    %114 = vector.shape_cast %112 : vector<8x96xf32> to vector<1x8x96xf32>
    %115 = tpu.concatenate %113, %114 in 0 : vector<1x8x96xf32>, vector<1x8x96xf32> -> vector<2x8x96xf32>
    %c0_20 = arith.constant 0 : index
    %c0_21 = arith.constant 0 : index
    %116 = vector.load %arg5[%c0_20, %c0_21] : memref<1x96xf32, #tpu.memory_space<vmem>>, vector<1x96xf32>
    %117 = vector.shape_cast %116 : vector<1x96xf32> to vector<1x1x96xf32>
    %118 = vector.broadcast %117 : vector<1x1x96xf32> to vector<2x8x96xf32>
    %119 = arith.addf %115, %118 : vector<2x8x96xf32>
    %cst_22 = arith.constant 0.000000e+00 : f32
    %120 = vector.broadcast %cst_22 : f32 to vector<2x8x96xf32>
    %121 = arith.maximumf %119, %120 : vector<2x8x96xf32>
    %122 = vector.extract_strided_slice %121 {offsets = [0, 0, 0], sizes = [2, 8, 48], strides = [1, 1, 1]} : vector<2x8x96xf32> to vector<2x8x48xf32>
    %123 = vector.extract_strided_slice %121 {offsets = [0, 0, 48], sizes = [2, 8, 48], strides = [1, 1, 1]} : vector<2x8x96xf32> to vector<2x8x48xf32>
    %124 = arith.maximumf %122, %123 : vector<2x8x48xf32>
    %125 = vector.extract_strided_slice %124 {offsets = [0, 0, 0], sizes = [2, 1, 48], strides = [1, 1, 1]} : vector<2x8x48xf32> to vector<2x1x48xf32>
    %126 = vector.shape_cast %125 : vector<2x1x48xf32> to vector<2x48xf32>
    %127 = vector.extract_strided_slice %124 {offsets = [0, 1, 0], sizes = [2, 1, 48], strides = [1, 1, 1]} : vector<2x8x48xf32> to vector<2x1x48xf32>
    %128 = vector.shape_cast %127 : vector<2x1x48xf32> to vector<2x48xf32>
    %129 = arith.maximumf %126, %128 : vector<2x48xf32>
    %130 = vector.extract_strided_slice %124 {offsets = [0, 2, 0], sizes = [2, 1, 48], strides = [1, 1, 1]} : vector<2x8x48xf32> to vector<2x1x48xf32>
    %131 = vector.shape_cast %130 : vector<2x1x48xf32> to vector<2x48xf32>
    %132 = vector.extract_strided_slice %124 {offsets = [0, 3, 0], sizes = [2, 1, 48], strides = [1, 1, 1]} : vector<2x8x48xf32> to vector<2x1x48xf32>
    %133 = vector.shape_cast %132 : vector<2x1x48xf32> to vector<2x48xf32>
    %134 = arith.maximumf %131, %133 : vector<2x48xf32>
    %135 = vector.extract_strided_slice %124 {offsets = [0, 4, 0], sizes = [2, 1, 48], strides = [1, 1, 1]} : vector<2x8x48xf32> to vector<2x1x48xf32>
    %136 = vector.shape_cast %135 : vector<2x1x48xf32> to vector<2x48xf32>
    %137 = vector.extract_strided_slice %124 {offsets = [0, 5, 0], sizes = [2, 1, 48], strides = [1, 1, 1]} : vector<2x8x48xf32> to vector<2x1x48xf32>
    %138 = vector.shape_cast %137 : vector<2x1x48xf32> to vector<2x48xf32>
    %139 = arith.maximumf %136, %138 : vector<2x48xf32>
    %140 = vector.extract_strided_slice %124 {offsets = [0, 6, 0], sizes = [2, 1, 48], strides = [1, 1, 1]} : vector<2x8x48xf32> to vector<2x1x48xf32>
    %141 = vector.shape_cast %140 : vector<2x1x48xf32> to vector<2x48xf32>
    %142 = vector.extract_strided_slice %124 {offsets = [0, 7, 0], sizes = [2, 1, 48], strides = [1, 1, 1]} : vector<2x8x48xf32> to vector<2x1x48xf32>
    %143 = vector.shape_cast %142 : vector<2x1x48xf32> to vector<2x48xf32>
    %144 = arith.maximumf %141, %143 : vector<2x48xf32>
    %145 = vector.shape_cast %129 : vector<2x48xf32> to vector<2x1x48xf32>
    %146 = vector.shape_cast %134 : vector<2x48xf32> to vector<2x1x48xf32>
    %147 = vector.shape_cast %139 : vector<2x48xf32> to vector<2x1x48xf32>
    %148 = vector.shape_cast %144 : vector<2x48xf32> to vector<2x1x48xf32>
    %149 = tpu.concatenate %145, %146, %147, %148 in 1 : vector<2x1x48xf32>, vector<2x1x48xf32>, vector<2x1x48xf32>, vector<2x1x48xf32> -> vector<2x4x48xf32>
    %150 = vector.extract_strided_slice %149 {offsets = [0, 0, 0], sizes = [2, 1, 48], strides = [1, 1, 1]} : vector<2x4x48xf32> to vector<2x1x48xf32>
    %151 = vector.shape_cast %150 : vector<2x1x48xf32> to vector<2x48xf32>
    %152 = vector.extract_strided_slice %149 {offsets = [0, 1, 0], sizes = [2, 1, 48], strides = [1, 1, 1]} : vector<2x4x48xf32> to vector<2x1x48xf32>
    %153 = vector.shape_cast %152 : vector<2x1x48xf32> to vector<2x48xf32>
    %154 = vector.extract_strided_slice %149 {offsets = [0, 2, 0], sizes = [2, 1, 48], strides = [1, 1, 1]} : vector<2x4x48xf32> to vector<2x1x48xf32>
    %155 = vector.shape_cast %154 : vector<2x1x48xf32> to vector<2x48xf32>
    %156 = vector.extract_strided_slice %149 {offsets = [0, 3, 0], sizes = [2, 1, 48], strides = [1, 1, 1]} : vector<2x4x48xf32> to vector<2x1x48xf32>
    %157 = vector.shape_cast %156 : vector<2x1x48xf32> to vector<2x48xf32>
    %158 = tpu.concatenate %151, %153, %155, %157 in 1 : vector<2x48xf32>, vector<2x48xf32>, vector<2x48xf32>, vector<2x48xf32> -> vector<2x192xf32>
    %159 = arith.truncf %158 : vector<2x192xf32> to vector<2x192xbf16>
    %c0_23 = arith.constant 0 : index
    %c0_24 = arith.constant 0 : index
    %160 = vector.load %arg6[%c0_23, %c0_24] : memref<192x128xbf16, #tpu.memory_space<vmem>>, vector<192x128xbf16>
    %cst_25 = arith.constant dense<0.000000e+00> : vector<2x128xf32>
    %161 = tpu.matmul %159, %160, %cst_25 {dimension_numbers = #tpu.dot_dimension_numbers<[1], [0], [0], [1], [0, 0, 1, 1], [], []>} : vector<2x192xbf16>, vector<192x128xbf16>, vector<2x128xf32> -> vector<2x128xf32>
    %c0_26 = arith.constant 0 : index
    %c0_27 = arith.constant 0 : index
    %162 = vector.load %arg7[%c0_26, %c0_27] : memref<1x128xf32, #tpu.memory_space<vmem>>, vector<1x128xf32>
    %163 = vector.broadcast %162 : vector<1x128xf32> to vector<2x128xf32>
    %164 = arith.addf %161, %163 : vector<2x128xf32>
    %cst_28 = arith.constant 0.000000e+00 : f32
    %165 = vector.broadcast %cst_28 : f32 to vector<2x128xf32>
    %166 = arith.maximumf %164, %165 : vector<2x128xf32>
    %167 = arith.truncf %166 : vector<2x128xf32> to vector<2x128xbf16>
    %c0_29 = arith.constant 0 : index
    %c0_30 = arith.constant 0 : index
    %168 = vector.load %arg8[%c0_29, %c0_30] : memref<128x128xbf16, #tpu.memory_space<vmem>>, vector<128x128xbf16>
    %cst_31 = arith.constant dense<0.000000e+00> : vector<2x128xf32>
    %169 = tpu.matmul %167, %168, %cst_31 {dimension_numbers = #tpu.dot_dimension_numbers<[1], [0], [0], [1], [0, 0, 1, 1], [], []>} : vector<2x128xbf16>, vector<128x128xbf16>, vector<2x128xf32> -> vector<2x128xf32>
    %c0_32 = arith.constant 0 : index
    %c0_33 = arith.constant 0 : index
    %170 = vector.load %arg9[%c0_32, %c0_33] : memref<1x128xf32, #tpu.memory_space<vmem>>, vector<1x128xf32>
    %171 = vector.broadcast %170 : vector<1x128xf32> to vector<2x128xf32>
    %172 = arith.addf %169, %171 : vector<2x128xf32>
    %cst_34 = arith.constant 0.000000e+00 : f32
    %173 = vector.broadcast %cst_34 : f32 to vector<2x128xf32>
    %174 = arith.maximumf %172, %173 : vector<2x128xf32>
    %175 = arith.truncf %174 : vector<2x128xf32> to vector<2x128xbf16>
    %c0_35 = arith.constant 0 : index
    %c0_36 = arith.constant 0 : index
    %176 = vector.load %arg10[%c0_35, %c0_36] : memref<128x128xbf16, #tpu.memory_space<vmem>>, vector<128x128xbf16>
    %cst_37 = arith.constant dense<0.000000e+00> : vector<2x128xf32>
    %177 = tpu.matmul %175, %176, %cst_37 {dimension_numbers = #tpu.dot_dimension_numbers<[1], [0], [0], [1], [0, 0, 1, 1], [], []>} : vector<2x128xbf16>, vector<128x128xbf16>, vector<2x128xf32> -> vector<2x128xf32>
    %c0_38 = arith.constant 0 : index
    %c0_39 = arith.constant 0 : index
    %178 = vector.load %arg11[%c0_38, %c0_39] : memref<1x128xf32, #tpu.memory_space<vmem>>, vector<1x128xf32>
    %179 = vector.broadcast %178 : vector<1x128xf32> to vector<2x128xf32>
    %180 = arith.addf %177, %179 : vector<2x128xf32>
    %c0_40 = arith.constant 0 : index
    %c0_41 = arith.constant 0 : index
    %181 = vector.load %arg12[%c0_40, %c0_41] : memref<2x128xf32, #tpu.memory_space<vmem>>, vector<2x128xf32>
    tpu.vector_store %arg12[%c0_40, %c0_41], %180 {strides = array<i32>} : memref<2x128xf32, #tpu.memory_space<vmem>>, vector<2x128xf32>,
    return
  }
  func.func @transform_0(%arg0: i32) -> (i32, i32, i32) {
    %c0_i32 = arith.constant 0 : i32
    %c0_i32_0 = arith.constant 0 : i32
    %c0_i32_1 = arith.constant 0 : i32
    return %arg0, %c0_i32, %c0_i32_0 : i32, i32, i32
  }
  func.func @transform_1(%arg0: i32) -> (i32, i32) {
    %c0_i32 = arith.constant 0 : i32
    %c0_i32_0 = arith.constant 0 : i32
    %c0_i32_1 = arith.constant 0 : i32
    return %c0_i32, %c0_i32_0 : i32, i32
  }
  func.func @transform_2(%arg0: i32) -> (i32, i32) {
    %c0_i32 = arith.constant 0 : i32
    %c0_i32_0 = arith.constant 0 : i32
    %c0_i32_1 = arith.constant 0 : i32
    return %c0_i32, %c0_i32_0 : i32, i32
  }
  func.func @transform_3(%arg0: i32) -> (i32, i32) {
    %c0_i32 = arith.constant 0 : i32
    %c0_i32_0 = arith.constant 0 : i32
    %c0_i32_1 = arith.constant 0 : i32
    return %c0_i32, %c0_i32_0 : i32, i32
  }
  func.func @transform_4(%arg0: i32) -> (i32, i32) {
    %c0_i32 = arith.constant 0 : i32
    %c0_i32_0 = arith.constant 0 : i32
    %c0_i32_1 = arith.constant 0 : i32
    return %c0_i32, %c0_i32_0 : i32, i32
  }
  func.func @transform_5(%arg0: i32) -> (i32, i32) {
    %c0_i32 = arith.constant 0 : i32
    %c0_i32_0 = arith.constant 0 : i32
    %c0_i32_1 = arith.constant 0 : i32
    return %c0_i32, %c0_i32_0 : i32, i32
  }
  func.func @transform_6(%arg0: i32) -> (i32, i32) {
    %c0_i32 = arith.constant 0 : i32
    %c0_i32_0 = arith.constant 0 : i32
    %c0_i32_1 = arith.constant 0 : i32
    return %c0_i32, %c0_i32_0 : i32, i32
  }
  func.func @transform_7(%arg0: i32) -> (i32, i32) {
    %c0_i32 = arith.constant 0 : i32
    %c0_i32_0 = arith.constant 0 : i32
    %c0_i32_1 = arith.constant 0 : i32
    return %c0_i32, %c0_i32_0 : i32, i32
  }
  func.func @transform_8(%arg0: i32) -> (i32, i32) {
    %c0_i32 = arith.constant 0 : i32
    %c0_i32_0 = arith.constant 0 : i32
    %c0_i32_1 = arith.constant 0 : i32
    return %c0_i32, %c0_i32_0 : i32, i32
  }
  func.func @transform_9(%arg0: i32) -> (i32, i32) {
    %c0_i32 = arith.constant 0 : i32
    %c0_i32_0 = arith.constant 0 : i32
    %c0_i32_1 = arith.constant 0 : i32
    return %c0_i32, %c0_i32_0 : i32, i32
  }
  func.func @transform_10(%arg0: i32) -> (i32, i32) {
    %c0_i32 = arith.constant 0 : i32
    %c0_i32_0 = arith.constant 0 : i32
    %c0_i32_1 = arith.constant 0 : i32
    return %c0_i32, %c0_i32_0 : i32, i32
  }
  func.func @transform_11(%arg0: i32) -> (i32, i32) {
    %c0_i32 = arith.constant 0 : i32
    %c0_i32_0 = arith.constant 0 : i32
    return %arg0, %c0_i32 : i32, i32
  }
}

</mosaic_0001>

<bundles_post_ra>
// kernel: simplenet_forward.1
= control target key start
LH: loop header
LB: loop body
LE: loop exit
PB: predicated region body
PF: predicated region fallthrough
CT: control target
= control target key end

     0   :  { %s1931_s14 = smov 28   ;;  %s1932_s15 = smov 84   ;;  %vm315_vm0 = vcmask 1045504   ;;  %s2628_s0 = inlined_call_operand.vmem [shape: f32[2,28,28], index: 0, kind: input, shape index: {}]   ;;  %s2629_s1 = inlined_call_operand.vmem [shape: bf16[140,144], index: 1, kind: input, shape index: {}]   ;;  %s2630_s2 = inlined_call_operand.vmem [shape: f32[1,144], index: 2, kind: input, shape index: {}]   ;;  %s2631_s3 = inlined_call_operand.vmem [shape: bf16[360,96], index: 3, kind: input, shape index: {}]   ;;  %s2632_s4 = inlined_call_operand.vmem [shape: f32[1,96], index: 4, kind: input, shape index: {}]   ;;  %s2633_s5 = inlined_call_operand.vmem [shape: bf16[192,128], index: 5, kind: input, shape index: {}]   ;;  %s2634_s6 = inlined_call_operand.vmem [shape: f32[1,128], index: 6, kind: input, shape index: {}]   ;;  %s2635_s7 = inlined_call_operand.vmem [shape: bf16[128,128], index: 7, kind: input, shape index: {}]   ;;  %s2636_s8 = inlined_call_operand.vmem [shape: f32[1,128], index: 8, kind: input, shape index: {}]   ;;  %s2637_s9 = inlined_call_operand.vmem [shape: bf16[128,128], index: 9, kind: input, shape index: {}]   ;;  %s2638_s10 = inlined_call_operand.vmem [shape: f32[1,128], index: 10, kind: input, shape index: {}]   ;;  %s2639_s11 = inlined_call_operand.hbm [shape: f32[2,128], index: 11, kind: output, shape index: {}]  }
   0x1   :  { %v46_v0 = vld [vmem:[%s2628_s0 + $0x1] sm:$0xff]  ;;  %v47_v1 = vld [vmem:[%s2628_s0 + $0x9] sm:$0xff]  ;;  %s1933_s16 = smov 56   ;;  %v48_v12 = vld [vmem:[%s2628_s0 + $0x11] sm:$0xff]  ;;  %s1934_s21 = smov 112  }
   0x2   :  { %v58_v2 = vld [vmem:[%s2628_s0 + $0x3] sm:$0xff]  ;;  %v1754_v3 = vpack.i.bf16 %v47_v1, %v46_v0  ;;  %v59_v4 = vld [vmem:[%s2628_s0 + $0xb] sm:$0xff]  ;;  %v60_v16 = vld [vmem:[%s2628_s0 + $0x13] sm:$0xff] }
   0x3   :  { %v52_v5 = vld [vmem:[%s2628_s0 + $0x2] sm:$0xff]  ;;  %v53_v6 = vld [vmem:[%s2628_s0 + $0xa] sm:$0xff]  ;;  %v1764_v7 = vpack.i.bf16 %v59_v4, %v58_v2  ;;  %v54_v13 = vld [vmem:[%s2628_s0 + $0x12] sm:$0xff] }
   0x4   :  { %v64_v8 = vld [vmem:[%s2628_s0 + $0x4] sm:$0xff]  ;;  %v65_v9 = vld [vmem:[%s2628_s0 + $0xc] sm:$0xff]  ;;  %1755 = vrot.lane.b32.xlu0 %v1754_v3, %s1931_s14  ;;  %v1759_v10 = vpack.i.bf16 %v53_v6, %v52_v5  ;;  %v1832_v19 = vld [vmem:[%s2629_s1 + $0x14] ss:$8 sps:$4 sm:$0xff]  }
   0x5   :  { %1765 = vrot.lane.b32.xlu1 %v1764_v7, %s1932_s15  ;;  %v1769_v11 = vpack.i.bf16 %v65_v9, %v64_v8  ;;  %v1829_v14 = vld [vmem:[%s2629_s1 + $0x4] ss:$8 sps:$4 sm:$0xff]   ;;  %v1831_v15 = vld [vmem:[%s2629_s1] ss:$8 sps:$4 sm:$0xff]   ;;  %v66_v20 = vld [vmem:[%s2628_s0 + $0x14] sm:$0xff] }
   0x6   :  { %v49_v17 = vld [vmem:[%s2628_s0 + $0x21] sm:$0xff]  ;;  %v50_v18 = vld [vmem:[%s2628_s0 + $0x29] sm:$0xff]  ;;  %322 = vmatprep.subr.bf16.mxu0 %v1829_v14  ;;  %379 = vmatprep.subr.bf16.mxu1 %v1829_v14  ;;  %v1838_v30 = vld [vmem:[%s2629_s1 + $0x34] ss:$8 sps:$4 sm:$0xff]  }
   0x7   :  { %v55_v21 = vld [vmem:[%s2628_s0 + $0x22] sm:$0xff]  ;;  %323 = vmatpush1.bf16.msra.mxu0 %v1831_v15  ;;  %v1834_v22 = vld [vmem:[%s2629_s1 + $0x10] ss:$8 sps:$4 sm:$0xff]   ;;  %380 = vmatpush1.bf16.msra.mxu1 %v1831_v15  ;;  %v1774_v26 = vpack.i.bf16 %v50_v18, %v49_v17  ;;  %v1844_v40 = vld [vmem:[%s2629_s1 + $0x54] ss:$8 sps:$4 sm:$0xff]  }
   0x8   :  { %1760 = vrot.lane.b32.xlu0 %v1759_v10, %s1933_s16  ;;  %324 = vmatprep.subr.bf16.mxu0 %v1832_v19  ;;  %v1835_v23 = vld [vmem:[%s2629_s1 + $0x24] ss:$8 sps:$4 sm:$0xff]   ;;  %v1837_v28 = vld [vmem:[%s2629_s1 + $0x20] ss:$8 sps:$4 sm:$0xff]   ;;  %v1840_v34 = vld [vmem:[%s2629_s1 + $0x30] ss:$8 sps:$4 sm:$0xff]  }
   0x9   :  { %1770 = vrot.lane.b32.xlu1 %v1769_v11, %s1934_s21  ;;  %v56_v24 = vld [vmem:[%s2628_s0 + $0x2a] sm:$0xff]  ;;  %381 = vmatprep.subr.bf16.mxu1 %v1832_v19  ;;  %v1855_v38 = vld [vmem:[%s2629_s1 + $0x80] ss:$8 sps:$4 sm:$0x3f]   ;;  %v57_v41 = vld [vmem:[%s2628_s0 + $0x32] sm:$0xff] }
   0xa   :  { %v61_v25 = vld [vmem:[%s2628_s0 + $0x23] sm:$0xff]  ;;  %v62_v27 = vld [vmem:[%s2628_s0 + $0x2b] sm:$0xff]  ;;  %v1779_v29 = vpack.i.bf16 %v56_v24, %v55_v21  ;;  %v317_v42 = vsel %vm315_vm0, %v1855_v38, 0  ;;  %v63_v44 = vld [vmem:[%s2628_s0 + $0x33] sm:$0xff] }
   0xb   :  { %325 = vmatpush1.bf16.msra.mxu0 %v1834_v22  ;;  %v67_v31 = vld [vmem:[%s2628_s0 + $0x24] sm:$0xff]  ;;  %v68_v32 = vld [vmem:[%s2628_s0 + $0x2c] sm:$0xff]  ;;  %382 = vmatpush1.bf16.msra.mxu1 %v1834_v22  ;;  %v1784_v33 = vpack.i.bf16 %v62_v27, %v61_v25  ;;  %v69_v46 = vld [vmem:[%s2628_s0 + $0x34] sm:$0xff] }
   0xc   :  { %80 = vrot.lane.b32.xlu0 %v48_v12, %s1931_s14  ;;  %326 = vmatprep.subr.bf16.mxu0 %v1835_v23  ;;  %v1789_v35 = vpack.i.bf16 %v68_v32, %v67_v31  ;;  %v1841_v36 = vld [vmem:[%s2629_s1 + $0x44] ss:$8 sps:$4 sm:$0xff]   ;;  %v1843_v37 = vld [vmem:[%s2629_s1 + $0x40] ss:$8 sps:$4 sm:$0xff]   ;;  %v51_v39 = vld [vmem:[%s2628_s0 + $0x31] sm:$0xff] }
   0xd   :  { %104 = vrot.lane.b32.xlu1 %v54_v13, %s1933_s16  ;;  %383 = vmatprep.subr.bf16.mxu1 %v1835_v23  ;;  %v1846_v43 = vld [vmem:[%s2629_s1 + $0x50] ss:$8 sps:$4 sm:$0xff]   ;;  %v1847_v45 = vld [vmem:[%s2629_s1 + $0x64] ss:$8 sps:$4 sm:$0xff]   ;;  %v1849_v47 = vld [vmem:[%s2629_s1 + $0x60] ss:$8 sps:$4 sm:$0xff]  }
   0xe   :  { %v1850_v48 = vld [vmem:[%s2629_s1 + $0x74] ss:$8 sps:$4 sm:$0xff]   ;;  %v1852_v49 = vld [vmem:[%s2629_s1 + $0x70] ss:$8 sps:$4 sm:$0xff]  }
   0xf   :  { %327 = vmatpush1.bf16.msra.mxu0 %v1837_v28  ;;  %384 = vmatpush1.bf16.msra.mxu1 %v1837_v28  ;;  %v1853_v50 = vld [vmem:[%s2629_s1 + $0x84] ss:$8 sps:$4 sm:$0x3f]  }
  0x10   :  { %128 = vrot.lane.b32.xlu0 %v60_v16, %s1932_s15  ;;  %328 = vmatprep.subr.bf16.mxu0 %v1838_v30 }
  0x11   :  { %152 = vrot.lane.b32.xlu1 %v66_v20, %s1934_s21  ;;  %385 = vmatprep.subr.bf16.mxu1 %v1838_v30 }
  0x13   :  { %329 = vmatpush1.bf16.msra.mxu0 %v1840_v34  ;;  %386 = vmatpush1.bf16.msra.mxu1 %v1840_v34 }
  0x14   :  { %1775 = vrot.lane.b32.xlu0 %v1774_v26, %s1931_s14  ;;  %330 = vmatprep.subr.bf16.mxu0 %v1841_v36 }
  0x15   :  { %1780 = vrot.lane.b32.xlu1 %v1779_v29, %s1933_s16  ;;  %387 = vmatprep.subr.bf16.mxu1 %v1841_v36 }
  0x17   :  { %331 = vmatpush1.bf16.msra.mxu0 %v1843_v37  ;;  %388 = vmatpush1.bf16.msra.mxu1 %v1843_v37 }
  0x18   :  { %1785 = vrot.lane.b32.xlu0 %v1784_v33, %s1932_s15  ;;  %332 = vmatprep.subr.bf16.mxu0 %v1844_v40 }
  0x19   :  { %1790 = vrot.lane.b32.xlu1 %v1789_v35, %s1934_s21  ;;  %389 = vmatprep.subr.bf16.mxu1 %v1844_v40 }
  0x1b   :  { %333 = vmatpush1.bf16.msra.mxu0 %v1846_v43  ;;  %390 = vmatpush1.bf16.msra.mxu1 %v1846_v43 }
  0x1c   :  { %86 = vrot.lane.b32.xlu0 %v51_v39, %s1931_s14  ;;  %334 = vmatprep.subr.bf16.mxu0 %v1847_v45 }
  0x1d   :  { %110 = vrot.lane.b32.xlu1 %v57_v41, %s1933_s16  ;;  %391 = vmatprep.subr.bf16.mxu1 %v1847_v45 }
  0x1f   :  { %335 = vmatpush1.bf16.msra.mxu0 %v1849_v47  ;;  %392 = vmatpush1.bf16.msra.mxu1 %v1849_v47 }
  0x20   :  { %134 = vrot.lane.b32.xlu0 %v63_v44, %s1932_s15  ;;  %336 = vmatprep.subr.bf16.mxu0 %v1850_v48 }
  0x21   :  { %158 = vrot.lane.b32.xlu1 %v69_v46, %s1934_s21  ;;  %393 = vmatprep.subr.bf16.mxu1 %v1850_v48 }
  0x23   :  { %337 = vmatpush1.bf16.msra.mxu0 %v1852_v49  ;;  %394 = vmatpush1.bf16.msra.mxu1 %v1852_v49 }
  0x24   :  { %1521 = vmatprep.subr.msk.bf16.mxu0 %vm315_vm0, %v1853_v50  ;;  %1524 = vmatprep.subr.msk.bf16.mxu1 %vm315_vm0, %v1853_v50 }
  0x27   :  { %339 = vmatpush1.bf16.msra.mxu0 %v317_v42  ;;  %396 = vmatpush1.bf16.msra.mxu1 %v317_v42 }
  0x28   :  { %16 = vsyncpa [#allocation3], 0  ;;  %vm166_vm1 = vcmask 228352   ;;  %v40_v55 = vld [vmem:[%s2628_s0] sm:$0xff]  ;;  %v41_v56 = vld [vmem:[%s2628_s0 + $0x8] sm:$0xff]  ;;  %vm173_vm2 = vcmask 457728  }
  0x29   :  { %vm180_vm3 = vcmask 687104   ;;  %vm187_vm4 = vcmask 916480   ;;  %v42_v3 = vld [vmem:[%s2628_s0 + $0x10] sm:$0xff]  ;;  %vm308_vm5 = vcmask 97280   ;;  %v43_v22 = vld [vmem:[%s2628_s0 + $0x20] sm:$0xff]  ;;  %v44_v23 = vld [vmem:[%s2628_s0 + $0x28] sm:$0xff] }
  0x2a   :  { %v45_v40 = vld [vmem:[%s2628_s0 + $0x30] sm:$0xff]  ;;  %vm599_vm6 = vcmask 1043456   ;;  %vm590_vm7 = vcmask 1040384   ;;  %vm593_vm8 = vcmask 1041408   ;;  %vm596_vm9 = vcmask 1042432   ;;  %s1938_s20 = smov 88  }
  0x2b   :  { %vm602_vm10 = vcmask 1044480   ;;  %vm607_vm11 = vcmask 1046528   ;;  %vm1936_vm12 = vmmov 0   ;;  %s1939_s14 = smov 16   ;;  %s1940_s22 = smov 72   ;;  %vm677_vm13 = vcmask 261120  }
  0x2c   :  { %vm866_vm14 = vcmask 850944   ;;  %vm668_vm15 = vcmask 588800   ;;  %s1941_s1 = smov 80   ;;  %s1943_s25 = smov 96  }
  0x2d   :  { %s1944_s26 = smov 48   ;;  %s1945_s0 = smov [#allocation2]  }
  0x76   :  { %v1756_v51 = vpop.permute.xlu0 %1755 }
  0x77   :  { %v1766_v52 = vpop.permute.xlu1 %1765  ;;  %v1758_v53 = vunpack.i.h.bf16 %v1756_v51  ;;  %v1757_v54 = vunpack.i.l.bf16 %v1756_v51 }
  0x78   :  { %v1768_v58 = vunpack.i.h.bf16 %v1766_v52  ;;  %v1767_v59 = vunpack.i.l.bf16 %v1766_v52 }
  0x79   :  { %v167_v63 = vsel %vm166_vm1, %v40_v55, %v1757_v54  ;;  %v168_v0 = vsel %vm166_vm1, %v41_v56, %v1758_v53 }
  0x7a   :  { %v1761_v57 = vpop.permute.xlu0 %1760 }
  0x7b   :  { %v1763_v60 = vunpack.i.h.bf16 %v1761_v57  ;;  %v1762_v61 = vunpack.i.l.bf16 %v1761_v57  ;;  %v1771_v62 = vpop.permute.xlu1 %1770  ;;  %v432_v57 = vlaneseq }
  0x7c   :  { %v1773_v1 = vunpack.i.h.bf16 %v1771_v62  ;;  %v1772_v2 = vunpack.i.l.bf16 %v1771_v62 }
  0x7d   :  { %v174_v4 = vsel %vm173_vm2, %v167_v63, %v1762_v61  ;;  %v175_v5 = vsel %vm173_vm2, %v168_v0, %v1763_v60  ;;  %v430_v60 = vld [vmem:[%s2630_s2] sm:$0x3] }
  0x7e   :  { %v81_v6 = vpop.permute.xlu0 %80  ;;  %v195_v7 = vpack.c.bf16 %v1773_v1, %v1772_v2  ;;  %v181_v8 = vsel %vm180_vm3, %v174_v4, %v1767_v59  ;;  %v182_v9 = vsel %vm180_vm3, %v175_v5, %v1768_v58  ;;  %v433_v58 = vshrl.u32 %v432_v57, 7  ;;  %v2297_v57 = vld [vmem:[%s2631_s3 + $0x98] sm:$0xff]  }
  0x7f   :  { %v169_v10 = vsel %vm166_vm1, %v42_v3, %v81_v6  ;;  %v105_v11 = vpop.permute.xlu1 %104  ;;  %v188_v12 = vsel %vm187_vm4, %v181_v8, %v1772_v2  ;;  %v189_v13 = vsel %vm187_vm4, %v182_v9, %v1773_v1 }
  0x80   :  { %v176_v14 = vsel %vm173_vm2, %v169_v10, %v105_v11  ;;  %1522 = vmatprep.mubr.msk.bf16.mxu0 %vm308_vm5, %v195_v7  ;;  %v194_v15 = vpack.c.bf16 %v189_v13, %v188_v12  ;;  %v434_v59 = vsub.s32 0, %v433_v58  ;;  %v438_v61 = vsub.s32 1, %v433_v58  ;;  %v2304_v58 = vld [vmem:[%s2631_s3 + $0x18] sm:$0xff]  }
  0x82   :  { %v129_v16 = vpop.permute.xlu0 %128  ;;  %355 = vmatmul.mubr.bf16.vlgmr.msra.gmra.mrb[0].mxu0 %v194_v15  ;;  %v435_v62 = vrot.slane %v430_v60, %v434_v59  ;;  %v439_v63 = vrot.slane %v430_v60, %v438_v61  ;;  %v2310_v59 = vld [vmem:[%s2631_s3 + $0x60] sm:$0xff]  }
  0x83   :  { %v183_v17 = vsel %vm180_vm3, %v176_v14, %v129_v16  ;;  %v153_v18 = vpop.permute.xlu1 %152  ;;  %v2316_v60 = vld [vmem:[%s2631_s3 + $0xa0] sm:$0xff]  }
  0x84   :  { %v197_v19 = vpack.c.bf16 %v153_v18, %v153_v18  ;;  %v190_v20 = vsel %vm187_vm4, %v183_v17, %v153_v18  ;;  %v2323_v61 = vld [vmem:[%s2631_s3 + $0x20] sm:$0xff]  }
  0x85   :  { %v196_v27 = vpack.c.bf16 %v190_v20, %v190_v20 }
  0x86   :  { %v1776_v21 = vpop.permute.xlu0 %1775  ;;  %1523 = vmatprep.mubr.msk.bf16.mxu0 %vm308_vm5, %v197_v19 }
  0x87   :  { %v1778_v24 = vunpack.i.h.bf16 %v1776_v21  ;;  %v1777_v25 = vunpack.i.l.bf16 %v1776_v21  ;;  %v1781_v26 = vpop.permute.xlu1 %1780 }
  0x88   :  { %v1783_v28 = vunpack.i.h.bf16 %v1781_v26  ;;  %v1782_v29 = vunpack.i.l.bf16 %v1781_v26 }
  0x89   :  { %v170_v30 = vsel %vm166_vm1, %v43_v22, %v1777_v25  ;;  %v171_v31 = vsel %vm166_vm1, %v44_v23, %v1778_v24 }
  0x8a   :  { %v177_v32 = vsel %vm173_vm2, %v170_v30, %v1782_v29  ;;  %v178_v33 = vsel %vm173_vm2, %v171_v31, %v1783_v28  ;;  %v1786_v34 = vpop.permute.xlu0 %1785  ;;  %365 = vmatmul.mubr.bf16.gmra.mrb[4].mxu0 %v196_v27 }
  0x8b   :  { %v1788_v35 = vunpack.i.h.bf16 %v1786_v34  ;;  %v1787_v36 = vunpack.i.l.bf16 %v1786_v34  ;;  %v1791_v37 = vpop.permute.xlu1 %1790 }
  0x8c   :  { %v1793_v38 = vunpack.i.h.bf16 %v1791_v37  ;;  %v1792_v39 = vunpack.i.l.bf16 %v1791_v37 }
  0x8d   :  { %v184_v41 = vsel %vm180_vm3, %v177_v32, %v1787_v36  ;;  %v185_v42 = vsel %vm180_vm3, %v178_v33, %v1788_v35 }
  0x8e   :  { %v199_v43 = vpack.c.bf16 %v1793_v38, %v1792_v39  ;;  %v87_v44 = vpop.permute.xlu0 %86  ;;  %v191_v45 = vsel %vm187_vm4, %v184_v41, %v1792_v39  ;;  %v192_v46 = vsel %vm187_vm4, %v185_v42, %v1793_v38 }
  0x8f   :  { %v172_v47 = vsel %vm166_vm1, %v45_v40, %v87_v44  ;;  %v111_v48 = vpop.permute.xlu1 %110  ;;  %v198_v49 = vpack.c.bf16 %v192_v46, %v191_v45  ;;  %v2239_v46 = vld [vmem:[%s2631_s3 + $0x80] sm:$0xff]   ;;  %vm674_vm1 = vcmask 719872  }
  0x90   :  { %1525 = vmatprep.mubr.msk.bf16.mxu1 %vm308_vm5, %v199_v43  ;;  %v179_v50 = vsel %vm173_vm2, %v172_v47, %v111_v48  ;;  %v1857_v47 = vld [vmem:[%s2631_s3 + $0x40] sm:$0xff]  }
  0x91   :  { %412 = vmatmul.mubr.bf16.vlgmr.msra.gmra.mrb[0].mxu1 %v198_v49  ;;  %v2247_v48 = vld [vmem:[%s2631_s3] sm:$0xff]   ;;  %v1935_v49 = vmov 0.0   ;;  %1585 = vmatprep.subr.bf16.mxu0 %v1857_v47 }
  0x92   :  { %v135_v51 = vpop.permute.xlu0 %134  ;;  %1663 = vmatprep.subr.bf16.mxu1 %v1935_v49  ;;  %1586 = vmatpush3.bf16.msra.mxu0 %v2247_v48 }
  0x93   :  { %v186_v52 = vsel %vm180_vm3, %v179_v50, %v135_v51  ;;  %v159_v53 = vpop.permute.xlu1 %158  ;;  %v2253_v50 = vld [vmem:[%s2631_s3 + $0x48] sm:$0xff]   ;;  %1664 = vmatpush3.bf16.msra.mxu1 %v2239_v46  ;;  %vm1108_vm3 = vcmask 392192  }
  0x94   :  { %v193_v54 = vsel %vm187_vm4, %v186_v52, %v159_v53  ;;  %v201_v55 = vpack.c.bf16 %v159_v53, %v159_v53  ;;  %v2259_v51 = vld [vmem:[%s2631_s3 + $0x88] sm:$0xff]   ;;  %1665 = vmatprep.subr.bf16.mxu1 %v1935_v49  ;;  %1587 = vmatprep.subr.bf16.mxu0 %v2253_v50  ;;  %v2272_v53 = vld [vmem:[%s2631_s3 + $0x50] sm:$0xff]   ;;  %vm1110_vm4 = vcmask 785408  }
  0x95   :  { %v200_v56 = vpack.c.bf16 %v193_v54, %v193_v54  ;;  %v2266_v52 = vld [vmem:[%s2631_s3 + $0x8] sm:$0xff]   ;;  %v2278_v54 = vld [vmem:[%s2631_s3 + $0x90] sm:$0xff]  }
  0x96   :  { %1526 = vmatprep.mubr.msk.bf16.mxu1 %vm308_vm5, %v201_v55  ;;  %1588 = vmatpush3.bf16.msra.mxu0 %v2266_v52  ;;  %v2285_v55 = vld [vmem:[%s2631_s3 + $0x10] sm:$0xff]   ;;  %vm1218_vm5 = vcmask 523264  }
  0x97   :  { %1666 = vmatpush3.bf16.msra.mxu1 %v2259_v51  ;;  %1589 = vmatprep.subr.bf16.mxu0 %v2272_v53 }
  0x98   :  { %1667 = vmatprep.subr.bf16.mxu1 %v1935_v49 }
  0x99   :  { %422 = vmatmul.mubr.bf16.gmra.mrb[4].mxu1 %v200_v56  ;;  %v2291_v56 = vld [vmem:[%s2631_s3 + $0x58] sm:$0xff]  }
  0x9a   :  { %1590 = vmatpush3.bf16.msra.mxu0 %v2285_v55  ;;  %1677 = vmatprep.mubr.msk.bf16.mxu1 %vm1936_vm12, %v1935_v49 }
  0x9b   :  { %1668 = vmatpush3.bf16.msra.mxu1 %v2278_v54  ;;  %1591 = vmatprep.subr.bf16.mxu0 %v2291_v56 }
  0x9c   :  { %1669 = vmatprep.subr.bf16.mxu1 %v1935_v49 }
  0x9e   :  { %1592 = vmatpush3.bf16.msra.mxu0 %v2304_v58 }
  0x9f   :  { %1670 = vmatpush3.bf16.msra.mxu1 %v2297_v57  ;;  %1593 = vmatprep.subr.bf16.mxu0 %v2310_v59 }
  0xa0   :  { %1671 = vmatprep.subr.bf16.mxu1 %v1935_v49 }
  0xa2   :  { %1594 = vmatpush3.bf16.msra.mxu0 %v2323_v61 }
  0xa3   :  { %1672 = vmatpush3.bf16.msra.mxu1 %v2316_v60 }
  0xa4   :  { %1673 = vmatprep.subr.bf16.mxu1 %v1935_v49 }
 0x155   :  { %v356_v0 = vpop.f32.mrb[0].mxu0 }
 0x156   :  { %v2200_v1 = vadd.f32 %v435_v62, %v356_v0  ;;  %v358_v2 = vpop.f32.mrb[1].mxu0  ;;  %v2342_v0 = vld [vmem:[%s2631_s3 + $0x28] sm:$0xff]  }
 0x157   :  { %v443_v3 = vadd.f32 %v439_v63, %v358_v2  ;;  %v360_v4 = vpop.f32.mrb[2].mxu0  ;;  %v1874_v2 = vld [vmem:[%s2631_s3 + $0xb0] ss:$0 sps:$4 sm:$0xff]  }
 0x158   :  { %v454_v5 = vmax.f32 %v2200_v1, 0.0  ;;  %v2203_v6 = vadd.f32 %v435_v62, %v360_v4  ;;  %v362_v7 = vpop.f32.mrb[3].mxu0 }
 0x159   :  { %v455_v8 = vmax.f32 %v443_v3, 0.0  ;;  %v445_v9 = vadd.f32 %v439_v63, %v362_v7  ;;  %v2352_v3 = vsel %vm599_vm6, %v1874_v2, 0 }
 0x15a   :  { %v456_v10 = vmax.f32 %v2203_v6, 0.0 }
 0x15b   :  { %v1794_v11 = vpack.i.bf16 %v455_v8, %v454_v5  ;;  %v457_v12 = vmax.f32 %v445_v9, 0.0 }
 0x15d   :  { %v1799_v13 = vpack.i.bf16 %v457_v12, %v456_v10  ;;  %1795 = vrot.lane.b32.xlu0 %v1794_v11, %s1933_s16  ;;  %v366_v14 = vpop.f32.mrb[4].mxu0 }
 0x15e   :  { %v2211_v15 = vadd.f32 %v435_v62, %v366_v14  ;;  %v368_v16 = vpop.f32.mrb[5].mxu0 }
 0x15f   :  { %v447_v17 = vadd.f32 %v439_v63, %v368_v16  ;;  %1800 = vrot.lane.b32.xlu1 %v1799_v13, %s1933_s16  ;;  %v370_v18 = vpop.f32.mrb[6].mxu0 }
 0x160   :  { %v458_v19 = vmax.f32 %v2211_v15, 0.0  ;;  %v371_v20 = vpop.f32.mrb[7].mxu0  ;;  %v2376_v15 = vld [vmem:[%s2631_s3 + $0x30] sm:$0xff]  }
 0x161   :  { %v459_v21 = vmax.f32 %v447_v17, 0.0 }
 0x163   :  { %v1804_v22 = vpack.i.bf16 %v459_v21, %v458_v19 }
 0x164   :  { %v413_v23 = vpop.f32.mrb[0].mxu1 }
 0x165   :  { %v2217_v24 = vadd.f32 %v435_v62, %v413_v23  ;;  %v415_v25 = vpop.f32.mrb[1].mxu1  ;;  %1805 = vrot.lane.b32.xlu0 %v1804_v22, %s1933_s16 }
 0x166   :  { %v449_v26 = vadd.f32 %v439_v63, %v415_v25  ;;  %v417_v27 = vpop.f32.mrb[2].mxu1 }
 0x167   :  { %v460_v28 = vmax.f32 %v2217_v24, 0.0  ;;  %v2221_v29 = vadd.f32 %v435_v62, %v417_v27  ;;  %v419_v30 = vpop.f32.mrb[3].mxu1 }
 0x168   :  { %v461_v31 = vmax.f32 %v449_v26, 0.0  ;;  %v451_v32 = vadd.f32 %v439_v63, %v419_v30 }
 0x169   :  { %v462_v33 = vmax.f32 %v2221_v29, 0.0 }
 0x16a   :  { %v1809_v34 = vpack.i.bf16 %v461_v31, %v460_v28  ;;  %v463_v35 = vmax.f32 %v451_v32, 0.0 }
 0x16c   :  { %v1814_v36 = vpack.i.bf16 %v463_v35, %v462_v33  ;;  %v423_v37 = vpop.f32.mrb[4].mxu1  ;;  %1810 = vrot.lane.b32.xlu1 %v1809_v34, %s1933_s16 }
 0x16d   :  { %v2229_v38 = vadd.f32 %v435_v62, %v423_v37  ;;  %v425_v39 = vpop.f32.mrb[5].mxu1  ;;  %v2329_v62 = vld [vmem:[%s2631_s3 + $0x68] sm:$0xff]  }
 0x16e   :  { %v453_v40 = vadd.f32 %v439_v63, %v425_v39  ;;  %1815 = vrot.lane.b32.xlu0 %v1814_v36, %s1933_s16  ;;  %v427_v41 = vpop.f32.mrb[6].mxu1  ;;  %v2335_v63 = vld [vmem:[%s2631_s3 + $0xa8] sm:$0xff]   ;;  %1595 = vmatprep.subr.bf16.mxu0 %v2329_v62 }
 0x16f   :  { %v464_v42 = vmax.f32 %v2229_v38, 0.0  ;;  %v428_v43 = vpop.f32.mrb[7].mxu1  ;;  %1674 = vmatpush3.bf16.msra.mxu1 %v2335_v63  ;;  %1596 = vmatpush3.bf16.msra.mxu0 %v2342_v0  ;;  %v2371_v41 = vld [vmem:[%s2631_s3 + $0x70] sm:$0xff]  }
 0x170   :  { %v465_v44 = vmax.f32 %v453_v40, 0.0  ;;  %1675 = vmatprep.subr.bf16.mxu1 %v1935_v49  ;;  %1597 = vmatprep.subr.bf16.mxu0 %v2371_v41 }
 0x172   :  { %v1819_v45 = vpack.i.bf16 %v465_v44, %v464_v42 }
 0x173   :  { %1676 = vmatpush3.bf16.msra.mxu1 %v2352_v3  ;;  %1598 = vmatpush3.bf16.msra.mxu0 %v2376_v15 }
 0x174   :  { %1820 = vrot.lane.b32.xlu1 %v1819_v45, %s1933_s16  ;;  %1615 = vmatprep.subr.bf16.mxu1 %v1857_v47 }
 0x1cf   :  { %v1796_v4 = vpop.permute.xlu0 %1795 }
 0x1d0   :  { %v1798_v7 = vunpack.i.h.bf16 %v1796_v4  ;;  %v1797_v8 = vunpack.i.l.bf16 %v1796_v4 }
 0x1d1   :  { %v1801_v9 = vpop.permute.xlu1 %1800 }
 0x1d2   :  { %v502_v11 = vsel %vm173_vm2, %v1797_v8, %v1798_v7  ;;  %v1803_v12 = vunpack.i.h.bf16 %v1801_v9  ;;  %v1802_v13 = vunpack.i.l.bf16 %v1801_v9 }
 0x1d3   :  { %v514_v14 = vmax.f32 %v454_v5, %v502_v11 }
 0x1d4   :  { %v503_v16 = vsel %vm173_vm2, %v1802_v13, %v1803_v12 }
 0x1d5   :  { %v522_v17 = vrot.slane %v514_v14, 1  ;;  %v515_v18 = vmax.f32 %v456_v10, %v503_v16  ;;  %v2393_v16 = vld [vmem:[%s2631_s3 + $0x78] sm:$0xff]  }
 0x1d6   :  { %1599 = vmatprep.subr.bf16.mxu0 %v2393_v16 }
 0x1d7   :  { %v526_v20 = vmax.f32 %v514_v14, %v522_v17  ;;  %v530_v21 = vrot.slane %v515_v18, 1  ;;  %v1806_v22 = vpop.permute.xlu0 %1805  ;;  %v2398_v17 = vld [vmem:[%s2631_s3 + $0x38] sm:$0xff]   ;;  %s1937_s3 = smov 32  }
 0x1d8   :  { %v1808_v23 = vunpack.i.h.bf16 %v1806_v22  ;;  %v1807_v25 = vunpack.i.l.bf16 %v1806_v22  ;;  %1600 = vmatpush3.bf16.msra.mxu0 %v2398_v17 }
 0x1d9   :  { %v546_v26 = vrot.slane %v526_v20, 1  ;;  %v550_v27 = vrot.slane %v526_v20, 2  ;;  %v534_v30 = vmax.f32 %v515_v18, %v530_v21  ;;  %v554_v1 = vrot.slane %v526_v20, 3  ;;  %1681 = vmatprep.subr.bf16.mxu0 %v1935_v49 }
 0x1da   :  { %v504_v31 = vsel %vm173_vm2, %v1807_v25, %v1808_v23 }
 0x1db   :  { %v591_v5 = vsel %vm590_vm7, %v526_v20, %v546_v26  ;;  %v560_v32 = vrot.slane %v534_v30, 4  ;;  %v516_v6 = vmax.f32 %v458_v19, %v504_v31  ;;  %v564_v34 = vrot.slane %v534_v30, 5 }
 0x1dc   :  { %v594_v10 = vsel %vm593_vm8, %v591_v5, %v550_v27  ;;  %v568_v36 = vrot.slane %v534_v30, 6  ;;  %v572_v2 = vrot.slane %v534_v30, 7 }
 0x1dd   :  { %v597_v35 = vsel %vm596_vm9, %v594_v10, %v554_v1  ;;  %v538_v37 = vrot.slane %v516_v6, 1 }
 0x1de   :  { %v1811_v39 = vpop.permute.xlu1 %1810  ;;  %v600_v40 = vsel %vm599_vm6, %v597_v35, %v560_v32 }
 0x1df   :  { %v1813_v19 = vunpack.i.h.bf16 %v1811_v39  ;;  %v1812_v43 = vunpack.i.l.bf16 %v1811_v39  ;;  %v603_v44 = vsel %vm602_vm10, %v600_v40, %v564_v34  ;;  %v542_v45 = vmax.f32 %v516_v6, %v538_v37 }
 0x1e0   :  { %v1816_v47 = vpop.permute.xlu0 %1815  ;;  %v605_v4 = vsel %vm315_vm0, %v603_v44, %v568_v36 }
 0x1e1   :  { %v505_v7 = vsel %vm173_vm2, %v1812_v43, %v1813_v19  ;;  %v1818_v8 = vunpack.i.h.bf16 %v1816_v47  ;;  %v1817_v9 = vunpack.i.l.bf16 %v1816_v47  ;;  %v578_v11 = vrot.slane %v542_v45, 1 }
 0x1e2   :  { %v517_v12 = vmax.f32 %v460_v28, %v505_v7  ;;  %v582_v13 = vrot.slane %v542_v45, 2  ;;  %v2388_v14 = vsel %vm607_vm11, %v605_v4, %v572_v2  ;;  %v586_v28 = vrot.slane %v542_v45, 3 }
 0x1e3   :  { %v506_v18 = vsel %vm173_vm2, %v1817_v9, %v1818_v8  ;;  %v610_v21 = vsel %vm590_vm7, %v542_v45, %v578_v11  ;;  %v656_v23 = vrot.slane %v2388_v14, 4  ;;  %v644_v31 = vrot.slane %v2388_v14, 3 }
 0x1e4   :  { %v523_v20 = vrot.slane %v517_v12, 1  ;;  %v518_v24 = vmax.f32 %v462_v33, %v506_v18  ;;  %v612_v22 = vsel %vm593_vm8, %v610_v21, %v582_v13  ;;  %v632_v43 = vrot.slane %v2388_v14, 2 }
 0x1e5   :  { %v614_v30 = vsel %vm596_vm9, %v612_v22, %v586_v28  ;;  %v620_v47 = vrot.slane %v2388_v14, 1 }
 0x1e6   :  { %v527_v25 = vmax.f32 %v517_v12, %v523_v20  ;;  %v531_v26 = vrot.slane %v518_v24, 1  ;;  %v1821_v27 = vpop.permute.xlu1 %1820  ;;  %v657_v1 = vrot.slane %v614_v30, 4  ;;  %v645_v5 = vrot.slane %v614_v30, 3 }
 0x1e7   :  { %v1823_v29 = vunpack.i.h.bf16 %v1821_v27  ;;  %v1822_v33 = vunpack.i.l.bf16 %v1821_v27  ;;  %v633_v37 = vrot.slane %v614_v30, 2  ;;  %v621_v2 = vrot.slane %v614_v30, 1 }
 0x1e8   :  { %v547_v32 = vrot.slane %v527_v25, 1  ;;  %v551_v6 = vrot.slane %v527_v25, 2  ;;  %v535_v10 = vmax.f32 %v518_v24, %v531_v26  ;;  %v658_v35 = vsel %vm599_vm6, %v656_v23, %v657_v1 }
 0x1e9   :  { %v507_v34 = vsel %vm173_vm2, %v1822_v33, %v1823_v29  ;;  %v646_v36 = vsel %vm602_vm10, %v644_v31, %v645_v5  ;;  %v555_v39 = vrot.slane %v527_v25, 3  ;;  %662 = vrot.lane.b32.xlu1 %v658_v35, %s1937_s3  ;;  %v634_v11 = vsel %vm315_vm0, %v632_v43, %v633_v37 }
 0x1ea   :  { %v592_v40 = vsel %vm590_vm7, %v527_v25, %v547_v32  ;;  %v561_v19 = vrot.slane %v535_v10, 4  ;;  %650 = vrot.lane.b32.xlu0 %v646_v36, %s1938_s20  ;;  %v519_v44 = vmax.f32 %v464_v42, %v507_v34  ;;  %v565_v4 = vrot.slane %v535_v10, 5 }
 0x1eb   :  { %v595_v45 = vsel %vm593_vm8, %v592_v40, %v551_v6  ;;  %v622_v12 = vsel %vm607_vm11, %v620_v47, %v621_v2  ;;  %v569_v13 = vrot.slane %v535_v10, 6  ;;  %v573_v24 = vrot.slane %v535_v10, 7 }
 0x1ec   :  { %v598_v7 = vsel %vm596_vm9, %v595_v45, %v555_v39  ;;  %v539_v8 = vrot.slane %v519_v44, 1  ;;  %vm1088_vm2 = vcmask 1041409  }
 0x1ed   :  { %v601_v9 = vsel %vm599_vm6, %v598_v7, %v561_v19  ;;  %638 = vrot.lane.b32.xlu1 %v634_v11, %s1939_s14 }
 0x1ee   :  { %v604_v18 = vsel %vm602_vm10, %v601_v9, %v565_v4  ;;  %626 = vrot.lane.b32.xlu0 %v622_v12, %s1940_s22  ;;  %v543_v38 = vmax.f32 %v519_v44, %v539_v8 }
 0x1ef   :  { %v606_v42 = vsel %vm315_vm0, %v604_v18, %v569_v13 }
 0x1f0   :  { %v579_v20 = vrot.slane %v543_v38, 1  ;;  %v583_v28 = vrot.slane %v543_v38, 2  ;;  %v587_v21 = vrot.slane %v543_v38, 3  ;;  %v2430_v22 = vsel %vm607_vm11, %v606_v42, %v573_v24 }
 0x1f1   :  { %v635_v27 = vrot.slane %v2430_v22, 2  ;;  %v623_v31 = vrot.slane %v2430_v22, 1  ;;  %v659_v6 = vrot.slane %v2430_v22, 4  ;;  %v647_v10 = vrot.slane %v2430_v22, 3 }
 0x1f2   :  { %v611_v23 = vsel %vm590_vm7, %v543_v38, %v579_v20 }
 0x1f3   :  { %v613_v25 = vsel %vm593_vm8, %v611_v23, %v583_v28  ;;  %v1879_v23 = vld [vmem:[%s2633_s5] sm:$0xff]  }
 0x1f4   :  { %v615_v26 = vsel %vm596_vm9, %v613_v25, %v587_v21  ;;  %v1942_v25 = vmov 0  }
 0x1f5   :  { %v636_v30 = vrot.slane %v615_v26, 2  ;;  %v624_v29 = vrot.slane %v615_v26, 1  ;;  %v660_v5 = vrot.slane %v615_v26, 4  ;;  %v648_v32 = vrot.slane %v615_v26, 3  ;;  %v1880_v26 = vld [vmem:[%s2633_s5 + $0x8] sm:$0xff]  }
 0x1f7   :  { %v637_v33 = vsel %vm315_vm0, %v635_v27, %v636_v30  ;;  %v625_v1 = vsel %vm607_vm11, %v623_v31, %v624_v29  ;;  %v661_v34 = vsel %vm599_vm6, %v659_v6, %v660_v5  ;;  %v649_v35 = vsel %vm602_vm10, %v647_v10, %v648_v32  ;;  %v1881_v27 = vld [vmem:[%s2633_s5 + $0x10] sm:$0xff]   ;;  %v1882_v30 = vld [vmem:[%s2633_s5 + $0x18] sm:$0xff]   ;;  %v1883_v31 = vld [vmem:[%s2633_s5 + $0x20] sm:$0xff]  }
 0x1f8   :  { %640 = vrot.lane.b32.xlu1 %v637_v33, %s1939_s14  ;;  %628 = vrot.lane.b32.xlu0 %v625_v1, %s1940_s22  ;;  %vm671_vm0 = vcmask 130048   ;;  %v1884_v29 = vld [vmem:[%s2633_s5 + $0x28] sm:$0xff]   ;;  %v1885_v33 = vld [vmem:[%s2633_s5 + $0x30] sm:$0xff]  }
 0x1f9   :  { %v1886_v1 = vld [vmem:[%s2633_s5 + $0x38] sm:$0xff]   ;;  %v1887_v5 = vld [vmem:[%s2633_s5 + $0x40] sm:$0xff]   ;;  %v1888_v32 = vld [vmem:[%s2633_s5 + $0x48] sm:$0xff]  }
 0x1fc   :  { %664 = vrot.lane.b32.xlu1 %v661_v34, %s1937_s3  ;;  %652 = vrot.lane.b32.xlu0 %v649_v35, %s1938_s20 }
 0x25b   :  { %v663_v36 = vpop.permute.xlu1 %662 }
 0x25c   :  { %v651_v37 = vpop.permute.xlu0 %650 }
 0x25d   :  { %v678_v39 = vsel %vm677_vm13, %v651_v37, %v663_v36 }
 0x25e   :  { %v682_v40 = vpack.c.bf16 %v678_v39, %v678_v39 }
 0x25f   :  { %v639_v19 = vpop.permute.xlu1 %638 }
 0x260   :  { %1678 = vmatmul.mubr.msk.bf16.vlgmr.msra.gmra.mrb[8].mxu1 %vm866_vm14, %v682_v40  ;;  %v627_v43 = vpop.permute.xlu0 %626  ;;  %v1889_v40 = vld [vmem:[%s2633_s5 + $0x50] sm:$0xff]  }
 0x261   :  { %1616 = vmatpush3.bf16.msra.mxu1 %v2247_v48  ;;  %v669_v44 = vsel %vm668_vm15, %v2388_v14, %v627_v43  ;;  %v672_v45 = vsel %vm671_vm0, %v627_v43, %v639_v19 }
 0x262   :  { %v675_v47 = vsel %vm674_vm1, %v672_v45, %v651_v37  ;;  %1617 = vmatprep.subr.bf16.mxu1 %v2253_v50  ;;  %v680_v4 = vpack.c.bf16 %v669_v44, %v669_v44 }
 0x263   :  { %v681_v2 = vpack.c.bf16 %v675_v47, %v675_v47 }
 0x265   :  { %1618 = vmatpush3.bf16.msra.mxu1 %v2266_v52  ;;  %905 = vmatprep.mubr.bf16.mxu0 %v681_v2  ;;  %v1890_v2 = vld [vmem:[%s2633_s5 + $0x58] sm:$0xff]  }
 0x266   :  { %906 = vmatmul.mubr.bf16.vlgmr.msra.gmra.mrb[8].mxu0 %v680_v4  ;;  %1619 = vmatprep.subr.bf16.mxu1 %v2272_v53 }
 0x267   :  { %1682 = vmatpush3.bf16.msra.mxu0 %v2239_v46  ;;  %1695 = vmatprep.mubr.msk.bf16.mxu0 %vm1936_vm12, %v1935_v49 }
 0x268   :  { %1683 = vmatprep.subr.bf16.mxu0 %v1935_v49 }
 0x269   :  { %1620 = vmatpush3.bf16.msra.mxu1 %v2285_v55 }
 0x26a   :  { %1621 = vmatprep.subr.bf16.mxu1 %v2291_v56  ;;  %v629_v48 = vpop.permute.xlu0 %628  ;;  %v641_v50 = vpop.permute.xlu1 %640 }
 0x26b   :  { %1684 = vmatpush3.bf16.msra.mxu0 %v2259_v51  ;;  %v673_v46 = vsel %vm671_vm0, %v629_v48, %v641_v50 }
 0x26c   :  { %1685 = vmatprep.subr.bf16.mxu0 %v1935_v49 }
 0x26d   :  { %1622 = vmatpush3.bf16.msra.mxu1 %v2304_v58 }
 0x26e   :  { %1623 = vmatprep.subr.bf16.mxu1 %v2310_v59  ;;  %v653_v52 = vpop.permute.xlu0 %652  ;;  %v665_v51 = vpop.permute.xlu1 %664 }
 0x26f   :  { %1686 = vmatpush3.bf16.msra.mxu0 %v2278_v54  ;;  %v676_v53 = vsel %vm674_vm1, %v673_v46, %v653_v52  ;;  %v670_v54 = vsel %vm668_vm15, %v2430_v22, %v629_v48  ;;  %v679_v56 = vsel %vm677_vm13, %v653_v52, %v665_v51  ;;  %v1891_v51 = vld [vmem:[%s2635_s7] sm:$0xff]  }
 0x270   :  { %1687 = vmatprep.subr.bf16.mxu0 %v1935_v49  ;;  %v684_v55 = vpack.c.bf16 %v676_v53, %v676_v53  ;;  %v685_v58 = vpack.c.bf16 %v679_v56, %v679_v56 }
 0x271   :  { %1624 = vmatpush3.bf16.msra.mxu1 %v2323_v61 }
 0x272   :  { %1625 = vmatprep.subr.bf16.mxu1 %v2329_v62  ;;  %988 = vmatprep.mubr.bf16.mxu1 %v684_v55 }
 0x273   :  { %1688 = vmatpush3.bf16.msra.mxu0 %v2297_v57  ;;  %v683_v57 = vpack.c.bf16 %v670_v54, %v670_v54 }
 0x274   :  { %1689 = vmatprep.subr.bf16.mxu0 %v1935_v49 }
 0x275   :  { %1626 = vmatpush3.bf16.msra.mxu1 %v2342_v0 }
 0x276   :  { %1627 = vmatprep.subr.bf16.mxu1 %v2371_v41 }
 0x277   :  { %1690 = vmatpush3.bf16.msra.mxu0 %v2316_v60 }
 0x278   :  { %1691 = vmatprep.subr.bf16.mxu0 %v1935_v49 }
 0x279   :  { %1628 = vmatpush3.bf16.msra.mxu1 %v2376_v15 }
 0x27a   :  { %1629 = vmatprep.subr.bf16.mxu1 %v2393_v16 }
 0x27b   :  { %1692 = vmatpush3.bf16.msra.mxu0 %v2335_v63 }
 0x27c   :  { %1693 = vmatprep.subr.bf16.mxu0 %v1935_v49 }
 0x27d   :  { %1630 = vmatpush3.bf16.msra.mxu1 %v2398_v17 }
 0x27e   :  { %1699 = vmatprep.subr.bf16.mxu1 %v1935_v49 }
 0x27f   :  { %1694 = vmatpush3.bf16.msra.mxu0 %v2352_v3  ;;  %v1552_v3 = vld [vmem:[%s2632_s4] ss:$0 sm:$0xff] }
 0x280   :  { %989 = vmatmul.mubr.bf16.vlgmr.msra.gmra.mrb[12].mxu1 %v683_v57  ;;  %1222 = vmatprep.subr.bf16.mxu0 %v1942_v25 }
 0x281   :  { %1715 = vmatprep.mubr.msk.bf16.mxu1 %vm1936_vm12, %v1935_v49  ;;  %1700 = vmatpush3.bf16.msra.mxu1 %v1891_v51 }
 0x282   :  { %1696 = vmatmul.mubr.msk.bf16.vlgmr.msra.gmra.mrb[12].mxu0 %vm866_vm14, %v685_v58  ;;  %1701 = vmatprep.subr.bf16.mxu1 %v1935_v49 }
 0x283   :  { %1223 = vmatpush1.bf16.msra.mxu0 %v1879_v23 }
 0x284   :  { %1224 = vmatprep.subr.bf16.mxu0 %v1942_v25 }
 0x287   :  { %1225 = vmatpush1.bf16.msra.mxu0 %v1880_v26 }
 0x288   :  { %1226 = vmatprep.subr.bf16.mxu0 %v1942_v25 }
 0x28b   :  { %1227 = vmatpush1.bf16.msra.mxu0 %v1881_v27 }
 0x28c   :  { %1228 = vmatprep.subr.bf16.mxu0 %v1942_v25 }
 0x28f   :  { %1229 = vmatpush1.bf16.msra.mxu0 %v1882_v30  ;;  %v1899_v30 = vld [vmem:[%s2637_s9] sm:$0xff]  }
 0x290   :  { %1230 = vmatprep.subr.bf16.mxu0 %v1942_v25 }
 0x293   :  { %1231 = vmatpush1.bf16.msra.mxu0 %v1883_v31 }
 0x294   :  { %1232 = vmatprep.subr.bf16.mxu0 %v1942_v25 }
 0x297   :  { %1233 = vmatpush1.bf16.msra.mxu0 %v1884_v29  ;;  %v1900_v29 = vld [vmem:[%s2637_s9 + $0x8] sm:$0xff]  }
 0x298   :  { %1234 = vmatprep.subr.bf16.mxu0 %v1942_v25 }
 0x29b   :  { %1235 = vmatpush1.bf16.msra.mxu0 %v1885_v33  ;;  %v1901_v33 = vld [vmem:[%s2637_s9 + $0x10] sm:$0xff]  }
 0x29c   :  { %1236 = vmatprep.subr.bf16.mxu0 %v1942_v25 }
 0x29f   :  { %1237 = vmatpush1.bf16.msra.mxu0 %v1886_v1  ;;  %v1902_v1 = vld [vmem:[%s2637_s9 + $0x18] sm:$0xff]  }
 0x2a0   :  { %1238 = vmatprep.subr.bf16.mxu0 %v1942_v25 }
 0x2a3   :  { %1239 = vmatpush1.bf16.msra.mxu0 %v1887_v5  ;;  %v1903_v5 = vld [vmem:[%s2637_s9 + $0x20] sm:$0xff]  }
 0x2a4   :  { %1240 = vmatprep.subr.bf16.mxu0 %v1942_v25 }
 0x2a7   :  { %1241 = vmatpush1.bf16.msra.mxu0 %v1888_v32  ;;  %v1904_v32 = vld [vmem:[%s2637_s9 + $0x28] sm:$0xff]  }
 0x2a8   :  { %1242 = vmatprep.subr.bf16.mxu0 %v1942_v25 }
 0x2ab   :  { %1243 = vmatpush1.bf16.msra.mxu0 %v1889_v40 }
 0x2ac   :  { %1244 = vmatprep.subr.bf16.mxu0 %v1942_v25 }
 0x2af   :  { %1245 = vmatpush1.bf16.msra.mxu0 %v1890_v2 }
 0x333   :  { %v947_v59 = vpop.f32.mrb[8].mxu1 }
 0x334   :  { %v1679_v60 = vpop.f32.mrb[9].mxu1 }
 0x335   :  { %v950_v61 = vpop.f32.mrb[10].mxu1  ;;  %v1892_v60 = vld [vmem:[%s2635_s7 + $0x8] sm:$0xff]  }
 0x336   :  { %v1680_v62 = vpop.f32.mrb[11].mxu1  ;;  %1702 = vmatpush3.bf16.msra.mxu1 %v1892_v60 }
 0x337   :  { %1703 = vmatprep.subr.bf16.mxu1 %v1935_v49 }
 0x339   :  { %v1601_v63 = vpop.f32.mrb[8].mxu0 }
 0x33a   :  { %v1602_v0 = vpop.f32.mrb[9].mxu0 }
 0x33b   :  { %v1603_v41 = vadd.f32 %v1602_v0, %v1601_v63  ;;  %v1604_v15 = vpop.f32.mrb[10].mxu0 }
 0x33c   :  { %v1605_v14 = vpop.f32.mrb[11].mxu0 }
 0x33d   :  { %v948_v16 = vadd.f32 %v1603_v41, %v947_v59  ;;  %v1893_v14 = vld [vmem:[%s2635_s7 + $0x10] sm:$0xff]  }
 0x33e   :  { %1704 = vmatpush3.bf16.msra.mxu1 %v1893_v14 }
 0x33f   :  { %v1043_v38 = vadd.f32 %v1552_v3, %v948_v16  ;;  %1705 = vmatprep.subr.bf16.mxu1 %v1935_v49 }
 0x341   :  { %v1045_v28 = vmax.f32 %v1043_v38, 0.0 }
 0x353   :  { %v1631_v17 = vpop.f32.mrb[12].mxu1 }
 0x354   :  { %v1632_v7 = vpop.f32.mrb[13].mxu1 }
 0x355   :  { %v1633_v8 = vadd.f32 %v1632_v7, %v1631_v17  ;;  %v1634_v9 = vpop.f32.mrb[14].mxu1  ;;  %v1030_v11 = vpop.f32.mrb[12].mxu0  ;;  %v1894_v17 = vld [vmem:[%s2635_s7 + $0x18] sm:$0xff]   ;;  %v1895_v7 = vld [vmem:[%s2635_s7 + $0x20] sm:$0xff]  }
 0x356   :  { %v1635_v12 = vpop.f32.mrb[15].mxu1  ;;  %v1697_v13 = vpop.f32.mrb[13].mxu0  ;;  %1706 = vmatpush3.bf16.msra.mxu1 %v1894_v17 }
 0x357   :  { %v1031_v18 = vadd.f32 %v1633_v8, %v1030_v11  ;;  %v1033_v42 = vpop.f32.mrb[14].mxu0  ;;  %1707 = vmatprep.subr.bf16.mxu1 %v1935_v49 }
 0x358   :  { %v1698_v20 = vpop.f32.mrb[15].mxu0 }
 0x359   :  { %v1044_v24 = vadd.f32 %v1552_v3, %v1031_v18  ;;  %v1896_v3 = vld [vmem:[%s2635_s7 + $0x28] sm:$0xff]   ;;  %v1897_v20 = vld [vmem:[%s2635_s7 + $0x30] sm:$0xff]  }
 0x35a   :  { %1708 = vmatpush3.bf16.msra.mxu1 %v1895_v7 }
 0x35b   :  { %v1046_v21 = vmax.f32 %v1044_v24, 0.0  ;;  %1709 = vmatprep.subr.bf16.mxu1 %v1935_v49  ;;  %v1898_v24 = vld [vmem:[%s2635_s7 + $0x38] sm:$0xff]  }
 0x35d   :  { %v1824_v22 = vpack.i.bf16 %v1046_v21, %v1045_v28 }
 0x35e   :  { %1710 = vmatpush3.bf16.msra.mxu1 %v1896_v3 }
 0x35f   :  { %1825 = vrot.lane.b32.xlu0 %v1824_v22, %s1941_s1  ;;  %1711 = vmatprep.subr.bf16.mxu1 %v1935_v49 }
 0x362   :  { %1712 = vmatpush3.bf16.msra.mxu1 %v1897_v20 }
 0x363   :  { %1713 = vmatprep.subr.bf16.mxu1 %v1935_v49 }
 0x366   :  { %1714 = vmatpush3.bf16.msra.mxu1 %v1898_v24 }
 0x367   :  { %1719 = vmatprep.subr.bf16.mxu1 %v1935_v49 }
 0x3d1   :  { %v1826_v6 = vpop.permute.xlu0 %1825 }
 0x3d2   :  { %v1828_v10 = vunpack.i.h.bf16 %v1826_v6  ;;  %v1827_v34 = vunpack.i.l.bf16 %v1826_v6  ;;  %v1905_v6 = vld [vmem:[%s2637_s9 + $0x30] sm:$0xff]  }
 0x3d4   :  { %v1056_v35 = vmax.f32 %v1046_v21, %v1828_v10  ;;  %v1055_v36 = vmax.f32 %v1045_v28, %v1827_v34  ;;  %v1553_v28 = vld [vmem:[%s2634_s6] ss:$0 sm:$0xff]  ;;  %v1906_v10 = vld [vmem:[%s2637_s9 + $0x38] sm:$0xff]  }
 0x3d5   :  { %v1567_v34 = vld [vmem:[%s2636_s8] ss:$0 sm:$0xff] }
 0x3d6   :  { %v1060_v37 = vrot.slane %v1056_v35, 1  ;;  %v1059_v39 = vrot.slane %v1055_v36, 1 }
 0x3d8   :  { %v1064_v19 = vmax.f32 %v1056_v35, %v1060_v37  ;;  %v1063_v43 = vmax.f32 %v1055_v36, %v1059_v39 }
 0x3da   :  { %v1068_v44 = vrot.slane %v1064_v19, 1  ;;  %v1072_v45 = vrot.slane %v1064_v19, 2  ;;  %v1067_v47 = vrot.slane %v1063_v43, 1  ;;  %v1071_v4 = vrot.slane %v1063_v43, 2 }
 0x3db   :  { %v1076_v48 = vrot.slane %v1064_v19, 3  ;;  %v1075_v46 = vrot.slane %v1063_v43, 3 }
 0x3dc   :  { %v1080_v50 = vsel %vm590_vm7, %v1064_v19, %v1068_v44  ;;  %v1079_v52 = vsel %vm590_vm7, %v1063_v43, %v1067_v47 }
 0x3dd   :  { %v1081_v53 = vsel %vm593_vm8, %v1079_v52, %v1071_v4  ;;  %v1082_v55 = vsel %vm593_vm8, %v1080_v50, %v1072_v45 }
 0x3de   :  { %v1083_v54 = vsel %vm596_vm9, %v1081_v53, %v1075_v46  ;;  %v1084_v56 = vsel %vm596_vm9, %v1082_v55, %v1076_v48 }
 0x3df   :  { %v1096_v57 = vrot.slane %v1083_v54, 2  ;;  %v1097_v58 = vrot.slane %v1084_v56, 1  ;;  %v1091_v59 = vrot.slane %v1083_v54, 1  ;;  %v1087_v61 = vrot.slane %v1084_v56, 7 }
 0x3e0   :  { %v1102_v0 = vrot.slane %v1083_v54, 3  ;;  %v1103_v41 = vrot.slane %v1084_v56, 2 }
 0x3e1   :  { %v1098_v62 = vsel %vm1088_vm2, %v1097_v58, %v1096_v57  ;;  %v1092_v63 = vsel %vm1088_vm2, %v1084_v56, %v1091_v59  ;;  %v1089_v15 = vsel %vm1088_vm2, %v1087_v61, %v1083_v54 }
 0x3e2   :  { %1099 = vrot.lane.b32.xlu0 %v1098_v62, %s1943_s25  ;;  %1093 = vrot.lane.b32.xlu1 %v1092_v63, %s1944_s26  ;;  %v1104_v16 = vsel %vm1088_vm2, %v1103_v41, %v1102_v0 }
 0x3e6   :  { %1105 = vrot.lane.b32.xlu1 %v1104_v16, %s1939_s14  ;;  %s1495_s14 = sshll.u32 %s1945_s0, 4  ;;  %s1496_s14 = int_to_ptr.vmem [resolvable:$true] %s1495_s14 }
 0x3e7   :  { %s1907_s8 = scalar_lea.vmem %s1496_s14, 32  ;;  %p1912_p1 = scmp.lt.s32.totalorder %s1496_s14, %s1496_s14 }
 0x3e8   :  { %p1908_p0 = scmp.ne.s32.totalorder %s1496_s14, %s1907_s8  ;;  %p1913_p2 = scmp.lt.s32.totalorder %s1907_s8, %s1907_s8 }
 0x3ea   :  { %p1914_p3 = por %p1913_p2, %p1912_p1 }
 0x3ec   :  { %p1915_p4 = pnand %p1914_p3, %p1908_p0 }
 0x454   :  { %v1094_v8 = vpop.permute.xlu1 %1093  ;;  %v1100_v9 = vpop.permute.xlu0 %1099 }
 0x455   :  { %v1109_v11 = vsel %vm1108_vm3, %v1089_v15, %v1094_v8 }
 0x456   :  { %v1111_v12 = vsel %vm1110_vm4, %v1109_v11, %v1100_v9 }
 0x457   :  { %v1113_v42 = vpack.c.bf16 %v1111_v12, %v1111_v12 }
 0x458   :  { %v1106_v13 = vpop.permute.xlu1 %1105 }
 0x459   :  { %v1112_v18 = vsel %vm671_vm0, %v1100_v9, %v1106_v13 }
 0x45a   :  { %v1114_v38 = vpack.c.bf16 %v1112_v18, %v1112_v18 }
 0x45c   :  { %1566 = vmatprep.mubr.msk.bf16.mxu0 %vm1218_vm5, %v1114_v38 }
 0x45d   :  { %1255 = vmatmul.mubr.bf16.vlgmr.msra.gmra.mrb[16].mxu0 %v1113_v42 }
 0x530   :  { %v1256_v21 = vpop.f32.mrb[16].mxu0 }
 0x531   :  { %v1257_v22 = vadd.f32 %v1553_v28, %v1256_v21  ;;  %v1258_v23 = vpop.f32.mrb[17].mxu0 }
 0x532   :  { %v1259_v25 = vpop.f32.mrb[18].mxu0 }
 0x533   :  { %v1262_v26 = vmax.f32 %v1257_v22, 0.0  ;;  %v1260_v27 = vpop.f32.mrb[19].mxu0 }
 0x535   :  { %v1263_v31 = vpack.c.bf16 %v1262_v26, %v1262_v26 }
 0x537   :  { %1716 = vmatmul.mubr.bf16.vlgmr.msra.gmra.mrb[16].mxu1 %v1263_v31 }
 0x538   :  { %1720 = vmatpush3.bf16.msra.mxu1 %v1899_v30  ;;  %1735 = vmatprep.mubr.msk.bf16.mxu1 %vm1936_vm12, %v1935_v49 }
 0x539   :  { %1721 = vmatprep.subr.bf16.mxu1 %v1935_v49 }
 0x53c   :  { %1722 = vmatpush3.bf16.msra.mxu1 %v1900_v29 }
 0x53d   :  { %1723 = vmatprep.subr.bf16.mxu1 %v1935_v49 }
 0x540   :  { %1724 = vmatpush3.bf16.msra.mxu1 %v1901_v33 }
 0x541   :  { %1725 = vmatprep.subr.bf16.mxu1 %v1935_v49 }
 0x544   :  { %1726 = vmatpush3.bf16.msra.mxu1 %v1902_v1 }
 0x545   :  { %1727 = vmatprep.subr.bf16.mxu1 %v1935_v49 }
 0x548   :  { %1728 = vmatpush3.bf16.msra.mxu1 %v1903_v5 }
 0x549   :  { %1729 = vmatprep.subr.bf16.mxu1 %v1935_v49 }
 0x54c   :  { %1730 = vmatpush3.bf16.msra.mxu1 %v1904_v32 }
 0x54d   :  { %1731 = vmatprep.subr.bf16.mxu1 %v1935_v49 }
 0x550   :  { %1732 = vmatpush3.bf16.msra.mxu1 %v1905_v6 }
 0x551   :  { %1733 = vmatprep.subr.bf16.mxu1 %v1935_v49  ;;  %v1576_v49 = vld [vmem:[%s2638_s10] ss:$0 sm:$0xff] }
 0x554   :  { %1734 = vmatpush3.bf16.msra.mxu1 %v1906_v10 }
 0x60a   :  { %v1369_v35 = vpop.f32.mrb[16].mxu1 }
 0x60b   :  { %v1370_v36 = vadd.f32 %v1567_v34, %v1369_v35  ;;  %v1717_v37 = vpop.f32.mrb[17].mxu1 }
 0x60c   :  { %v1372_v39 = vpop.f32.mrb[18].mxu1 }
 0x60d   :  { %v1375_v40 = vmax.f32 %v1370_v36, 0.0  ;;  %v1718_v19 = vpop.f32.mrb[19].mxu1 }
 0x60f   :  { %v1376_v43 = vpack.c.bf16 %v1375_v40, %v1375_v40 }
 0x611   :  { %1736 = vmatmul.mubr.bf16.vlgmr.msra.gmra.mrb[20].mxu1 %v1376_v43 }
 0x6e4   :  { %v1482_v44 = vpop.f32.mrb[20].mxu1 }
 0x6e5   :  { %v1483_v45 = vadd.f32 %v1576_v49, %v1482_v44  ;;  %v1737_v47 = vpop.f32.mrb[21].mxu1 }
 0x6e6   :  { %v1485_v2 = vpop.f32.mrb[22].mxu1 }
 0x6e7   :  { %1488 = vst [vmem:[#allocation2] sm:$0x3] %v1483_v45  ;;  %v1738_v4 = vpop.f32.mrb[23].mxu1 }
 0x6e8   :  { %1918 = shalt.err (!%p1915_p4)
}
 0x6e9   :  { %s1919_s10 = scalar_lea.hbm %s2639_s11, 32 }
 0x6ea   :  { %p1920_p5 = scmp.ne.s32.totalorder %s2639_s11, %s1919_s10  ;;  %p1923_p6 = scmp.lt.u32.totalorder %s1919_s10, %s2639_s11 }
 0x6ec   :  { %p1925_p7 = pnand %p1923_p6, %p1920_p5 }
 0x6ee   :  { %1928 = shalt.err (!%p1925_p7)
}
 0x6ef   :  { %1498 = dma.vmem_to_hbm [thread:$0]  %s1496_s14, 32, %s2639_s11, [#allocation3]  }
 0x6f0   :  { %1929 = dma.done.wait [#allocation3], 32  }
 0x6f1   :  { %1930 = vsyncadd [#allocation3], 4294967264 }
 0x6f2   :  { %1502 = vsyncpa [#allocation3], 1 }

</bundles_post_ra>
